<compile_context>
chip_gen: v7x
topology: tpu7x:2x2x1
jax: 0.10.0
libtpu: 0.0.40
codegen_flags: <defaults>
</compile_context>

<pallas_src>
import functools

import jax
import jax.numpy as jnp
import numpy as np
from jax import lax
from jax.experimental import pallas as pl
from jax.experimental.pallas import tpu as pltpu

LN_EPS = 1e-5  # PyTorch nn.LayerNorm default


# ---------------------------------------------------------------------------
# Hardware-aware sizing helpers
# ---------------------------------------------------------------------------
def _vmem_capacity_bytes():
    """Physical VMEM per TensorCore; conservative fallback = v7x (64 MiB)."""
    try:
        return int(pltpu.get_tpu_info().vmem_capacity_bytes)
    except Exception:
        return 64 * 1024 * 1024


def _vmem_limit(working_set_bytes, cap):
    """Scoped-VMEM request: working set + headroom, capped at 75% of physical
    VMEM (the old hard 100 MiB cap exceeded v7x's 64 MiB)."""
    want = int(working_set_bytes) + (8 << 20)
    hi = int(0.75 * cap)
    return int(min(max(want, 16 << 20), hi))


def _plan_p_tiles(P, target=512):
    """Row tiling of the flattened (i, k) axis for kernels 1 and 3.

    Returns (tile_p, P_pad).  tile_p is either the full extent or a multiple of
    128 dividing P_pad.  For awkward P we pad (wrapper pads inputs / slices the
    output) instead of silently using one giant block.
    """
    if P <= 2 * target:
        return P, P
    t = target
    while t >= 128:
        if P % t == 0:
            return t, P
        t -= 128
    t = target
    return t, ((P + t - 1) // t) * t


def _pick_tile_n(N):
    """i-row tile for kernel 2.  The E_out column block's lane dim is the tile,
    so it must be a multiple of 128 or the full N."""
    if N <= 128:
        return N
    if N % 128 == 0:
        return 128
    # TODO(synk): pad N for awkward sizes instead of using full rows.
    return N


def _pick_head_block(H, N, ti, msz, budget):
    """Largest head block (divisor of H, preferably a multiple of 8) whose
    kernel-2 working set (double-buffered V/E/Va blocks) fits `budget`."""
    def ws(hb):
        v_blocks = 2 * (2 * hb * N * N * msz)     # V_in + V_out, double-buffered
        e_blocks = 2 * (2 * hb * ti * N * msz)    # E_in row + E_out col tiles
        o_blocks = 2 * (2 * hb * ti * N * msz)    # Va_in + Va_out tiles
        return v_blocks + e_blocks + o_blocks + (2 << 20)
    cands = sorted({d for d in range(8, H + 1, 8) if H % d == 0} | {H},
                   reverse=True)
    for hb in cands:
        if ws(hb) <= budget:
            return hb
    return cands[-1]


def _pick_n_chunks(rows, max_rows=256):
    """Smallest chunk count so each kernel-1 projection chunk is <= max_rows
    rows (and a multiple of 8), bounding the live f32 slab."""
    if rows <= max_rows:
        return 1
    for d in range(2, rows + 1):
        if rows % d == 0 and rows // d <= max_rows and (rows // d) % 8 == 0:
            return d
    return 1


# ---------------------------------------------------------------------------
# Kernel 1: LayerNorm + fused lin_V/lin_E projection + mask + siglin
#   head-major output rows: [V_in(0:H), V_out(H:2H), E_in(2H:3H), E_out(3H:4H)]
# ---------------------------------------------------------------------------
def proj_kernel(e_ref, mask_ref, wt_ref, b_ref, out_ref, *, n_chunks, gate_dtype):
    # e_ref   : [1, tile_p, C]   channels-last edges
    # mask_ref: [1, 1, tile_p]   lane-dense mask (one value per (i,k) position)
    # wt_ref  : [8H, C]          fused (LN affine + lin_V + lin_E) weight,
    #                            rows = [gates(4H) | lins(4H)]
    # b_ref   : [8H, 1]          fused bias (beta folded in), f32
    # out_ref : [1, 4H, tile_p]  gated head-major output
    x = e_ref[0].astype(jnp.float32)                           # [P, C]

    # LayerNorm over channels; the affine (gamma/beta) is folded into wt/b.
    mu = jnp.mean(x, axis=-1, keepdims=True)
    var = jnp.mean(jnp.square(x - mu), axis=-1, keepdims=True)
    x_ln = ((x - mu) * lax.rsqrt(var + LN_EPS)).astype(wt_ref.dtype)

    h4 = out_ref.shape[1]                                      # 4H
    kc = h4 // n_chunks
    m = mask_ref[0]                                            # [1, tile_p]

    # Head-chunked projection + gating: bounds the live f32 slab to
    # ~2*kc*tile_p*4 bytes and lets chunk stores overlap the next matmul.
    for c in range(n_chunks):
        lo, hi = c * kc, (c + 1) * kc
        g = lax.dot_general(wt_ref[lo:hi, :], x_ln, (((1,), (1,)), ((), ())),
                            preferred_element_type=jnp.float32) + b_ref[lo:hi, :]
        l = lax.dot_general(wt_ref[h4 + lo:h4 + hi, :], x_ln,
                            (((1,), (1,)), ((), ())),
                            preferred_element_type=jnp.float32) + b_ref[h4 + lo:h4 + hi, :]
        # siglin via tanh: sigmoid(g) = 0.5*(tanh(g/2)+1) -> one EUP op.
        # Gate math runs in `gate_dtype` (bf16 on the fast path: v6e/v7x have
        # bf16 EUP/VPU; the result is stored bf16 anyway).
        gate = 0.5 * (jnp.tanh((0.5 * (g + m)).astype(gate_dtype)) + 1.0)
        out_ref[0, lo:hi, :] = (gate * l.astype(gate_dtype)).astype(out_ref.dtype)


# ---------------------------------------------------------------------------
# Kernel 2: tiled triangular (per-head) matmuls
#   Va_in[h,i,j]  = sum_k E_in[h,i,k]  * V_in[h,j,k]
#   Va_out[h,i,j] = sum_k E_out[h,k,i] * V_out[h,k,j]
# ---------------------------------------------------------------------------
def tri_kernel(v_in_ref, v_out_ref, e_in_ref, e_out_ref, va_in_ref, va_out_ref):
    # v_in_ref / v_out_ref : [1, Hb, N, N]   (VMEM-resident across i-tiles)
    # e_in_ref             : [1, Hb, ti, N]  row tile of E_in
    # e_out_ref            : [1, Hb, N, ti]  column tile of E_out
    # va_in_ref/va_out_ref : [1, Hb, ti, N]
    va_in_ref[0] = lax.dot_general(
        e_in_ref[0], v_in_ref[0],
        (((2,), (2,)), ((0,), (0,))),          # contract k (lane dim of both)
        preferred_element_type=jnp.float32).astype(va_in_ref.dtype)
    # 'hki,hkj->hij' expressed as a transposed-LHS dot_general (contraction on
    # the sublane dim): the MXU consumes this natively, no per-head vxpose.
    va_out_ref[0] = lax.dot_general(
        e_out_ref[0], v_out_ref[0],
        (((1,), (1,)), ((0,), (0,))),          # contract k (sublane dim of both)
        preferred_element_type=jnp.float32).astype(va_out_ref.dtype)


# ---------------------------------------------------------------------------
# Kernel 3: lin_O projection + final siglin, channels-last output
# ---------------------------------------------------------------------------
def out_kernel(va_in_ref, va_out_ref, wo_in_ref, wo_out_ref, bo_ref, out_ref,
               *, gate_dtype):
    # va_in_ref/va_out_ref : [1, H, tile_p] head-major
    # wo_in/wo_out         : [H, 2C]
    # bo_ref               : [1, 2C] f32
    # out_ref              : [1, tile_p, C]
    o = (lax.dot_general(va_in_ref[0], wo_in_ref[...], (((0,), (0,)), ((), ())),
                         preferred_element_type=jnp.float32)
         + lax.dot_general(va_out_ref[0], wo_out_ref[...], (((0,), (0,)), ((), ())),
                           preferred_element_type=jnp.float32)
         + bo_ref[...])                                        # [tile_p, 2C] f32
    C = out_ref.shape[2]
    gate = 0.5 * (jnp.tanh((0.5 * o[:, :C]).astype(gate_dtype)) + 1.0)
    out_ref[0] = (gate.astype(jnp.float32) * o[:, C:]).astype(out_ref.dtype)
    # TODO(synk): for production C < 128 the [tile_p, C] store is lane-padded
    # (masked vst); pack 128//C rows per store (or confirm C == 128) if the
    # store path shows up in the bundle.


# ---------------------------------------------------------------------------
# Wrapper
# ---------------------------------------------------------------------------
def triangular_update(e, mask, params, *, matmul_dtype=jnp.bfloat16):
    """Forward pass of TriangularUpdate.

    e    : [B, N, N, C]  edges, channels-last
    mask : [B, N, N, 1]  additive gate mask
    params: gamma/beta [C]; wV/wE [C, 4H]; bV/bE [4H]; wO [2H, 2C]; bO [2C]
    """
    B, N, _, C = e.shape
    H = params['wV'].shape[1] // 4
    P = N * N
    msz = jnp.dtype(matmul_dtype).itemsize
    out_dtype = e.dtype
    out_isz = jnp.dtype(out_dtype).itemsize
    f32 = jnp.float32

    vmem_cap = _vmem_capacity_bytes()
    budget2 = int(0.4 * vmem_cap)   # kernel-2 working set: <~50% VMEM (v7x ~25 MiB)

    # ---- fold LayerNorm affine + lin_V + lin_E into one projection ----------
    wV, wE = params['wV'].astype(f32), params['wE'].astype(f32)
    bV, bE = params['bV'].astype(f32), params['bE'].astype(f32)
    gamma, beta = params['gamma'].astype(f32), params['beta'].astype(f32)

    gate_w = jnp.concatenate(
        [wV[:, 0:H], wV[:, 2 * H:3 * H], wE[:, 0:H], wE[:, 2 * H:3 * H]], axis=1)
    lin_w = jnp.concatenate(
        [wV[:, H:2 * H], wV[:, 3 * H:4 * H], wE[:, H:2 * H], wE[:, 3 * H:4 * H]], axis=1)
    gate_b = jnp.concatenate([bV[0:H], bV[2 * H:3 * H], bE[0:H], bE[2 * H:3 * H]])
    lin_b = jnp.concatenate([bV[H:2 * H], bV[3 * H:4 * H], bE[H:2 * H], bE[3 * H:4 * H]])
    w_comb = jnp.concatenate([gate_w, lin_w], axis=1)          # [C, 8H]
    b_comb = jnp.concatenate([gate_b, lin_b])                  # [8H]
    w_eff = gamma[:, None] * w_comb                            # (x*g+b)@W = x@(g*W)+b@W
    b_eff = (beta @ w_comb + b_comb).reshape(8 * H, 1)         # [8H, 1] f32
    wt = jnp.transpose(w_eff).astype(matmul_dtype)             # [8H, C]

    wO = params['wO'].astype(matmul_dtype)                     # [2H, 2C]
    wo_in, wo_out = wO[:H], wO[H:]
    bo = params['bO'].astype(f32).reshape(1, 2 * C)

    # ---- kernel 1: LN + fused projection + mask + siglin (head-major) -------
    tile_p, P_pad = _plan_p_tiles(P)
    n_pt = P_pad // tile_p
    e_flat = e.reshape(B, P, C)
    mask_flat = mask.reshape(B, 1, P)                          # lane-dense mask
    if P_pad != P:                 # awkward P: pad + slice instead of one giant block
        e_flat = jnp.pad(e_flat, ((0, 0), (0, P_pad - P), (0, 0)))
        mask_flat = jnp.pad(mask_flat, ((0, 0), (0, 0), (0, P_pad - P)))

    h4 = 4 * H
    n_chunks = _pick_n_chunks(h4)
    gate_dtype = matmul_dtype

    blk1 = (2 * (tile_p * C * e.dtype.itemsize + tile_p * 4 + h4 * tile_p * msz)
            + 8 * H * C * msz + 8 * H * 4
            + 2 * (h4 // n_chunks) * tile_p * 4 + tile_p * C * 4)
    g = pl.pallas_call(
        functools.partial(proj_kernel, n_chunks=n_chunks, gate_dtype=gate_dtype),
        out_shape=jax.ShapeDtypeStruct((B, h4, P_pad), matmul_dtype),
        grid_spec=pltpu.PrefetchScalarGridSpec(
            num_scalar_prefetch=0, grid=(B, n_pt),
            in_specs=[
                pl.BlockSpec((1, tile_p, C), lambda b, p: (b, p, 0)),
                pl.BlockSpec((1, 1, tile_p), lambda b, p: (b, 0, p)),
                pl.BlockSpec((8 * H, C), lambda b, p: (0, 0)),
                pl.BlockSpec((8 * H, 1), lambda b, p: (0, 0)),
            ],
            out_specs=pl.BlockSpec((1, h4, tile_p), lambda b, p: (b, 0, p))),
        compiler_params=pltpu.CompilerParams(
            dimension_semantics=("parallel", "parallel"),
            vmem_limit_bytes=_vmem_limit(blk1, vmem_cap)),
    )(e_flat, mask_flat, wt, b_eff)

    if P_pad != P:
        g = g[:, :, :P]
    g4 = g.reshape(B, h4, N, N)                                # free reshape

    # ---- kernel 2: tiled triangular per-head matmuls -------------------------
    ti = _pick_tile_n(N)
    n_it = N // ti
    hb = _pick_head_block(H, N, ti, msz, budget2)
    n_hb = H // hb

    blk2 = (2 * (2 * hb * N * N * msz)       # V slabs (double-buffered)
            + 2 * (2 * hb * ti * N * msz)    # E row/col tiles
            + 2 * (2 * hb * ti * N * msz))   # Va output tiles
    va_shape = jax.ShapeDtypeStruct((B, H, N, N), matmul_dtype)
    # NOTE: Va precision — the k-sum is accumulated in f32 on the MXU; only the
    # final value is rounded to `matmul_dtype` here (error does not grow with
    # N).  Pass matmul_dtype=jnp.float32 if full-precision Va is required.
    # TODO(synk): sweep pipeline_mode=pl.Buffered(3) on the streamed E/Va specs
    # (and Buffered(1) on the resident V slabs) once on hardware.
    va_in, va_out = pl.pallas_call(
        tri_kernel,
        out_shape=(va_shape, va_shape),
        grid_spec=pltpu.PrefetchScalarGridSpec(
            num_scalar_prefetch=0, grid=(B, n_hb, n_it),
            in_specs=[
                # V_in / V_out slabs: index_map invariant over the innermost
                # i-tile axis -> fetched once per (batch, head-block), resident.
                pl.BlockSpec((1, hb, N, N), lambda b, h, i: (b, h, 0, 0)),
                pl.BlockSpec((1, hb, N, N), lambda b, h, i: (b, n_hb + h, 0, 0)),
                # E_in row tiles / E_out column tiles: streamed per i-tile.
                pl.BlockSpec((1, hb, ti, N), lambda b, h, i: (b, 2 * n_hb + h, i, 0)),
                pl.BlockSpec((1, hb, N, ti), lambda b, h, i: (b, 3 * n_hb + h, 0, i)),
            ],
            out_specs=(
                pl.BlockSpec((1, hb, ti, N), lambda b, h, i: (b, h, i, 0)),
                pl.BlockSpec((1, hb, ti, N), lambda b, h, i: (b, h, i, 0)),
            )),
        compiler_params=pltpu.CompilerParams(
            dimension_semantics=("parallel", "parallel", "arbitrary"),
            vmem_limit_bytes=_vmem_limit(blk2, vmem_cap)),
    )(g4, g4, g4, g4)

    # ---- kernel 3: lin_O + final siglin (channels-last) ----------------------
    va_in_f = va_in.reshape(B, H, P)                           # free reshapes
    va_out_f = va_out.reshape(B, H, P)
    if P_pad != P:
        pad = ((0, 0), (0, 0), (0, P_pad - P))
        va_in_f = jnp.pad(va_in_f, pad)
        va_out_f = jnp.pad(va_out_f, pad)

    blk3 = (2 * (2 * H * tile_p * msz) + 2 * (2 * H * 2 * C * msz) + 2 * C * 4
            + 2 * tile_p * C * out_isz + tile_p * 2 * C * 4)
    out = pl.pallas_call(
        functools.partial(out_kernel, gate_dtype=gate_dtype),
        out_shape=jax.ShapeDtypeStruct((B, P_pad, C), out_dtype),
        grid_spec=pltpu.PrefetchScalarGridSpec(
            num_scalar_prefetch=0, grid=(B, n_pt),
            in_specs=[
                pl.BlockSpec((1, H, tile_p), lambda b, p: (b, 0, p)),
                pl.BlockSpec((1, H, tile_p), lambda b, p: (b, 0, p)),
                pl.BlockSpec((H, 2 * C), lambda b, p: (0, 0)),
                pl.BlockSpec((H, 2 * C), lambda b, p: (0, 0)),
                pl.BlockSpec((1, 2 * C), lambda b, p: (0, 0)),
            ],
            out_specs=pl.BlockSpec((1, tile_p, C), lambda b, p: (b, p, 0))),
        compiler_params=pltpu.CompilerParams(
            dimension_semantics=("parallel", "parallel"),
            vmem_limit_bytes=_vmem_limit(blk3, vmem_cap)),
    )(va_in_f, va_out_f, wo_in, wo_out, bo)

    if P_pad != P:
        out = out[:, :P, :]
    return out.reshape(B, N, N, C)                             # free reshape


# ---------------------------------------------------------------------------
# Plain-JAX reference (mirrors the PyTorch forward exactly, all f32)
# ---------------------------------------------------------------------------
def reference(e, mask, p):
    mu = e.mean(-1, keepdims=True)
    var = ((e - mu) ** 2).mean(-1, keepdims=True)
    e_ln = (e - mu) / jnp.sqrt(var + LN_EPS) * p['gamma'] + p['beta']
    pv = e_ln @ p['wV'] + p['bV']
    pe = e_ln @ p['wE'] + p['bE']
    V_in_g, V_in_l, V_out_g, V_out_l = jnp.split(pv, 4, axis=-1)
    E_in_g, E_in_l, E_out_g, E_out_l = jnp.split(pe, 4, axis=-1)
    sig = lambda g, l: jax.nn.sigmoid(g) * l
    V_in = sig(V_in_g + mask, V_in_l)
    V_out = sig(V_out_g + mask, V_out_l)
    E_in = sig(E_in_g + mask, E_in_l)
    E_out = sig(E_out_g + mask, E_out_l)
    Va_in = jnp.einsum('bikh,bjkh->bijh', E_in, V_in)
    Va_out = jnp.einsum('bkih,bkjh->bijh', E_out, V_out)
    Va = jnp.concatenate([Va_in, Va_out], axis=-1)
    o = Va @ p['wO'] + p['bO']
    C = e.shape[-1]
    return sig(o[..., :C], o[..., C:])


if __name__ == "__main__":
    B, N, C, H = 2, 8, 32, 4  # batch, seq, edge_width, num_heads

    key = jax.random.PRNGKey(0)
    ks = jax.random.split(key, 10)

    # Deterministic synthetic parameters (weights stored as [in, out]).
    params = {
        'gamma': 1.0 + 0.1 * jax.random.normal(ks[8], (C,), jnp.float32),
        'beta': 0.1 * jax.random.normal(ks[9], (C,), jnp.float32),
        'wV': 0.1 * jax.random.normal(ks[0], (C, 4 * H), jnp.float32),
        'bV': 0.1 * jax.random.normal(ks[1], (4 * H,), jnp.float32),
        'wE': 0.1 * jax.random.normal(ks[2], (C, 4 * H), jnp.float32),
        'bE': 0.1 * jax.random.normal(ks[3], (4 * H,), jnp.float32),
        'wO': 0.1 * jax.random.normal(ks[4], (2 * H, 2 * C), jnp.float32),
        'bO': 0.1 * jax.random.normal(ks[5], (2 * C,), jnp.float32),
    }

    e = jax.random.normal(ks[6], (B, N, N, C), jnp.float32)
    mask = jax.random.normal(ks[7], (B, N, N, 1), jnp.float32)

    run = jax.jit(triangular_update, static_argnames=("matmul_dtype",))
    ref = reference(e, mask, params)

    # f32 MXU operands/gates: tight check of the kernel logic.
    out_f32 = jax.block_until_ready(run(e, mask, params, matmul_dtype=jnp.float32))
    np.testing.assert_allclose(np.asarray(out_f32), np.asarray(ref),
                               rtol=1e-3, atol=1e-3)

    # bf16 MXU operands / bf16 intermediates & gates (default fast path).
    out_bf16 = jax.block_until_ready(run(e, mask, params))
    np.testing.assert_allclose(np.asarray(out_bf16), np.asarray(ref),
                               rtol=3e-2, atol=3e-2)

    print("KERNEL_OK")
</pallas_src>

<mosaic_0001>
module attributes {stable_mosaic.version = 11 : i64} {
  func.func @tri_kernel(%arg0: i32, %arg1: i32, %arg2: i32, %arg3: memref<1x4x8x8xf32, #tpu.memory_space<vmem>>, %arg4: memref<1x4x8x8xf32, #tpu.memory_space<vmem>>, %arg5: memref<1x4x8x8xf32, #tpu.memory_space<vmem>>, %arg6: memref<1x4x8x8xf32, #tpu.memory_space<vmem>>, %arg7: memref<1x4x8x8xf32, #tpu.memory_space<vmem>>, %arg8: memref<1x4x8x8xf32, #tpu.memory_space<vmem>>) attributes {dimension_semantics = [#tpu.dimension_semantics<parallel>, #tpu.dimension_semantics<parallel>, #tpu.dimension_semantics<arbitrary>], iteration_bounds = array<i64: 2, 1, 1>, scalar_prefetch = 0 : i64, scratch_operands = 0 : i64, tpu.core_type = #tpu.core_type<tc>, window_params = [{transform_indices = @transform_0, window_bounds = array<i64: 1, 4, 8, 8>}, {transform_indices = @transform_1, window_bounds = array<i64: 1, 4, 8, 8>}, {transform_indices = @transform_2, window_bounds = array<i64: 1, 4, 8, 8>}, {transform_indices = @transform_3, window_bounds = array<i64: 1, 4, 8, 8>}, {transform_indices = @transform_4, window_bounds = array<i64: 1, 4, 8, 8>}, {transform_indices = @transform_5, window_bounds = array<i64: 1, 4, 8, 8>}]} {
    %c0 = arith.constant 0 : index
    %c0_0 = arith.constant 0 : index
    %c0_1 = arith.constant 0 : index
    %c0_2 = arith.constant 0 : index
    %0 = vector.load %arg5[%c0, %c0_0, %c0_1, %c0_2] : memref<1x4x8x8xf32, #tpu.memory_space<vmem>>, vector<1x4x8x8xf32>
    %1 = vector.shape_cast %0 : vector<1x4x8x8xf32> to vector<4x8x8xf32>
    %c0_3 = arith.constant 0 : index
    %c0_4 = arith.constant 0 : index
    %c0_5 = arith.constant 0 : index
    %c0_6 = arith.constant 0 : index
    %2 = vector.load %arg3[%c0_3, %c0_4, %c0_5, %c0_6] : memref<1x4x8x8xf32, #tpu.memory_space<vmem>>, vector<1x4x8x8xf32>
    %3 = vector.shape_cast %2 : vector<1x4x8x8xf32> to vector<4x8x8xf32>
    %cst = arith.constant dense<0.000000e+00> : vector<4x8x8xf32>
    %4 = tpu.matmul %1, %3, %cst {dimension_numbers = #tpu.dot_dimension_numbers<[2], [2], [1], [1], [0, 0, 0, 1, 1, 1], [0], [0]>} : vector<4x8x8xf32>, vector<4x8x8xf32>, vector<4x8x8xf32> -> vector<4x8x8xf32>
    %c0_7 = arith.constant 0 : index
    %c0_8 = arith.constant 0 : index
    %c0_9 = arith.constant 0 : index
    %c0_10 = arith.constant 0 : index
    %5 = vector.load %arg7[%c0_7, %c0_8, %c0_9, %c0_10] : memref<1x4x8x8xf32, #tpu.memory_space<vmem>>, vector<1x4x8x8xf32>
    %6 = vector.shape_cast %5 : vector<1x4x8x8xf32> to vector<4x8x8xf32>
    %7 = vector.shape_cast %4 : vector<4x8x8xf32> to vector<1x4x8x8xf32>
    tpu.vector_store %arg7[%c0_7, %c0_8, %c0_9, %c0_10], %7 {strides = array<i32>} : memref<1x4x8x8xf32, #tpu.memory_space<vmem>>, vector<1x4x8x8xf32>,
    %c0_11 = arith.constant 0 : index
    %c0_12 = arith.constant 0 : index
    %c0_13 = arith.constant 0 : index
    %c0_14 = arith.constant 0 : index
    %8 = vector.load %arg6[%c0_11, %c0_12, %c0_13, %c0_14] : memref<1x4x8x8xf32, #tpu.memory_space<vmem>>, vector<1x4x8x8xf32>
    %9 = vector.shape_cast %8 : vector<1x4x8x8xf32> to vector<4x8x8xf32>
    %c0_15 = arith.constant 0 : index
    %c0_16 = arith.constant 0 : index
    %c0_17 = arith.constant 0 : index
    %c0_18 = arith.constant 0 : index
    %10 = vector.load %arg4[%c0_15, %c0_16, %c0_17, %c0_18] : memref<1x4x8x8xf32, #tpu.memory_space<vmem>>, vector<1x4x8x8xf32>
    %11 = vector.shape_cast %10 : vector<1x4x8x8xf32> to vector<4x8x8xf32>
    %cst_19 = arith.constant dense<0.000000e+00> : vector<4x8x8xf32>
    %12 = tpu.matmul %9, %11, %cst_19 {dimension_numbers = #tpu.dot_dimension_numbers<[1], [1], [2], [2], [0, 0, 0, 2, 1, 2], [0], [0]>} : vector<4x8x8xf32>, vector<4x8x8xf32>, vector<4x8x8xf32> -> vector<4x8x8xf32>
    %c0_20 = arith.constant 0 : index
    %c0_21 = arith.constant 0 : index
    %c0_22 = arith.constant 0 : index
    %c0_23 = arith.constant 0 : index
    %13 = vector.load %arg8[%c0_20, %c0_21, %c0_22, %c0_23] : memref<1x4x8x8xf32, #tpu.memory_space<vmem>>, vector<1x4x8x8xf32>
    %14 = vector.shape_cast %13 : vector<1x4x8x8xf32> to vector<4x8x8xf32>
    %15 = vector.shape_cast %12 : vector<4x8x8xf32> to vector<1x4x8x8xf32>
    tpu.vector_store %arg8[%c0_20, %c0_21, %c0_22, %c0_23], %15 {strides = array<i32>} : memref<1x4x8x8xf32, #tpu.memory_space<vmem>>, vector<1x4x8x8xf32>,
    return
  }
  func.func @transform_0(%arg0: i32, %arg1: i32, %arg2: i32) -> (i32, i32, i32, i32) {
    %c0_i32 = arith.constant 0 : i32
    %c0_i32_0 = arith.constant 0 : i32
    %c0_i32_1 = arith.constant 0 : i32
    return %arg0, %arg1, %c0_i32, %c0_i32_0 : i32, i32, i32, i32
  }
  func.func @transform_1(%arg0: i32, %arg1: i32, %arg2: i32) -> (i32, i32, i32, i32) {
    %c1_i32 = arith.constant 1 : i32
    %0 = arith.addi %c1_i32, %arg1 : i32
    %c0_i32 = arith.constant 0 : i32
    %c0_i32_0 = arith.constant 0 : i32
    %c0_i32_1 = arith.constant 0 : i32
    return %arg0, %0, %c0_i32, %c0_i32_0 : i32, i32, i32, i32
  }
  func.func @transform_2(%arg0: i32, %arg1: i32, %arg2: i32) -> (i32, i32, i32, i32) {
    %c2_i32 = arith.constant 2 : i32
    %0 = arith.addi %c2_i32, %arg1 : i32
    %c0_i32 = arith.constant 0 : i32
    %c0_i32_0 = arith.constant 0 : i32
    return %arg0, %0, %arg2, %c0_i32 : i32, i32, i32, i32
  }
  func.func @transform_3(%arg0: i32, %arg1: i32, %arg2: i32) -> (i32, i32, i32, i32) {
    %c3_i32 = arith.constant 3 : i32
    %0 = arith.addi %c3_i32, %arg1 : i32
    %c0_i32 = arith.constant 0 : i32
    %c0_i32_0 = arith.constant 0 : i32
    return %arg0, %0, %c0_i32, %arg2 : i32, i32, i32, i32
  }
  func.func @transform_4(%arg0: i32, %arg1: i32, %arg2: i32) -> (i32, i32, i32, i32) {
    %c0_i32 = arith.constant 0 : i32
    %c0_i32_0 = arith.constant 0 : i32
    return %arg0, %arg1, %arg2, %c0_i32 : i32, i32, i32, i32
  }
  func.func @transform_5(%arg0: i32, %arg1: i32, %arg2: i32) -> (i32, i32, i32, i32) {
    %c0_i32 = arith.constant 0 : i32
    %c0_i32_0 = arith.constant 0 : i32
    return %arg0, %arg1, %arg2, %c0_i32 : i32, i32, i32, i32
  }
}

module attributes {stable_mosaic.version = 11 : i64} {
  func.func @proj_kernel(%arg0: i32, %arg1: i32, %arg2: memref<1x64x32xf32, #tpu.memory_space<vmem>>, %arg3: memref<1x1x64xf32, #tpu.memory_space<vmem>>, %arg4: memref<32x32xf32, #tpu.memory_space<vmem>>, %arg5: memref<32x1xf32, #tpu.memory_space<vmem>>, %arg6: memref<1x16x64xf32, #tpu.memory_space<vmem>>) attributes {dimension_semantics = [#tpu.dimension_semantics<parallel>, #tpu.dimension_semantics<parallel>], iteration_bounds = array<i64: 2, 1>, scalar_prefetch = 0 : i64, scratch_operands = 0 : i64, tpu.core_type = #tpu.core_type<tc>, window_params = [{transform_indices = @transform_0, window_bounds = array<i64: 1, 64, 32>}, {transform_indices = @transform_1, window_bounds = array<i64: 1, 1, 64>}, {pipeline_mode = #tpu.pipeline_mode<synchronous>, transform_indices = @transform_2, window_bounds = array<i64: 32, 32>}, {pipeline_mode = #tpu.pipeline_mode<synchronous>, transform_indices = @transform_3, window_bounds = array<i64: 32, 1>}, {transform_indices = @transform_4, window_bounds = array<i64: 1, 16, 64>}]} {
    %c0 = arith.constant 0 : index
    %c0_0 = arith.constant 0 : index
    %c0_1 = arith.constant 0 : index
    %0 = vector.load %arg2[%c0, %c0_0, %c0_1] : memref<1x64x32xf32, #tpu.memory_space<vmem>>, vector<1x64x32xf32>
    %1 = vector.shape_cast %0 : vector<1x64x32xf32> to vector<64x32xf32>
    %cst = arith.constant dense<0.000000e+00> : vector<64xf32>
    %2 = vector.multi_reduction <add>, %1, %cst [1] : vector<64x32xf32> to vector<64xf32>
    %3 = vector.shape_cast %2 : vector<64xf32> to vector<64x1xf32>
    %cst_2 = arith.constant 3.200000e+01 : f32
    %4 = vector.broadcast %cst_2 : f32 to vector<64x1xf32>
    %5 = arith.divf %3, %4 : vector<64x1xf32>
    %6 = vector.broadcast %5 : vector<64x1xf32> to vector<64x32xf32>
    %7 = arith.subf %1, %6 : vector<64x32xf32>
    %8 = arith.mulf %7, %7 : vector<64x32xf32>
    %cst_3 = arith.constant dense<0.000000e+00> : vector<64xf32>
    %9 = vector.multi_reduction <add>, %8, %cst_3 [1] : vector<64x32xf32> to vector<64xf32>
    %10 = vector.shape_cast %9 : vector<64xf32> to vector<64x1xf32>
    %cst_4 = arith.constant 3.200000e+01 : f32
    %11 = vector.broadcast %cst_4 : f32 to vector<64x1xf32>
    %12 = arith.divf %10, %11 : vector<64x1xf32>
    %13 = vector.broadcast %5 : vector<64x1xf32> to vector<64x32xf32>
    %14 = arith.subf %1, %13 : vector<64x32xf32>
    %cst_5 = arith.constant 9.99999974E-6 : f32
    %15 = vector.broadcast %cst_5 : f32 to vector<64x1xf32>
    %16 = arith.addf %12, %15 : vector<64x1xf32>
    %17 = math.rsqrt %16 : vector<64x1xf32>
    %18 = vector.broadcast %17 : vector<64x1xf32> to vector<64x32xf32>
    %19 = arith.mulf %14, %18 : vector<64x32xf32>
    %c0_6 = arith.constant 0 : index
    %c0_7 = arith.constant 0 : index
    %c0_8 = arith.constant 0 : index
    %20 = vector.load %arg3[%c0_6, %c0_7, %c0_8] : memref<1x1x64xf32, #tpu.memory_space<vmem>>, vector<1x1x64xf32>
    %21 = vector.shape_cast %20 : vector<1x1x64xf32> to vector<1x64xf32>
    %c0_9 = arith.constant 0 : index
    %c0_10 = arith.constant 0 : index
    %22 = vector.load %arg4[%c0_9, %c0_10] : memref<32x32xf32, #tpu.memory_space<vmem>>, vector<16x32xf32>
    %cst_11 = arith.constant dense<0.000000e+00> : vector<16x64xf32>
    %23 = tpu.matmul %22, %19, %cst_11 {dimension_numbers = #tpu.dot_dimension_numbers<[1], [1], [0], [0], [0, 0, 1, 0], [], []>} : vector<16x32xf32>, vector<64x32xf32>, vector<16x64xf32> -> vector<16x64xf32>
    %c0_12 = arith.constant 0 : index
    %c0_13 = arith.constant 0 : index
    %24 = vector.load %arg5[%c0_12, %c0_13] : memref<32x1xf32, #tpu.memory_space<vmem>>, vector<16x1xf32>
    %25 = vector.broadcast %24 : vector<16x1xf32> to vector<16x64xf32>
    %26 = arith.addf %23, %25 : vector<16x64xf32>
    %c16 = arith.constant 16 : index
    %c0_14 = arith.constant 0 : index
    %27 = vector.load %arg4[%c16, %c0_14] : memref<32x32xf32, #tpu.memory_space<vmem>>, vector<16x32xf32>
    %cst_15 = arith.constant dense<0.000000e+00> : vector<16x64xf32>
    %28 = tpu.matmul %27, %19, %cst_15 {dimension_numbers = #tpu.dot_dimension_numbers<[1], [1], [0], [0], [0, 0, 1, 0], [], []>} : vector<16x32xf32>, vector<64x32xf32>, vector<16x64xf32> -> vector<16x64xf32>
    %c16_16 = arith.constant 16 : index
    %c0_17 = arith.constant 0 : index
    %29 = vector.load %arg5[%c16_16, %c0_17] : memref<32x1xf32, #tpu.memory_space<vmem>>, vector<16x1xf32>
    %30 = vector.broadcast %29 : vector<16x1xf32> to vector<16x64xf32>
    %31 = arith.addf %28, %30 : vector<16x64xf32>
    %32 = vector.broadcast %21 : vector<1x64xf32> to vector<16x64xf32>
    %33 = arith.addf %26, %32 : vector<16x64xf32>
    %cst_18 = arith.constant 5.000000e-01 : f32
    %34 = vector.broadcast %cst_18 : f32 to vector<16x64xf32>
    %35 = arith.mulf %34, %33 : vector<16x64xf32>
    %36 = math.tanh %35 : vector<16x64xf32>
    %cst_19 = arith.constant 1.000000e+00 : f32
    %37 = vector.broadcast %cst_19 : f32 to vector<16x64xf32>
    %38 = arith.addf %36, %37 : vector<16x64xf32>
    %cst_20 = arith.constant 5.000000e-01 : f32
    %39 = vector.broadcast %cst_20 : f32 to vector<16x64xf32>
    %40 = arith.mulf %39, %38 : vector<16x64xf32>
    %41 = arith.mulf %40, %31 : vector<16x64xf32>
    %c0_21 = arith.constant 0 : index
    %c0_22 = arith.constant 0 : index
    %c0_23 = arith.constant 0 : index
    %42 = vector.load %arg6[%c0_21, %c0_22, %c0_23] : memref<1x16x64xf32, #tpu.memory_space<vmem>>, vector<1x16x64xf32>
    %43 = vector.shape_cast %42 : vector<1x16x64xf32> to vector<16x64xf32>
    %44 = vector.shape_cast %41 : vector<16x64xf32> to vector<1x16x64xf32>
    tpu.vector_store %arg6[%c0_21, %c0_22, %c0_23], %44 {strides = array<i32>} : memref<1x16x64xf32, #tpu.memory_space<vmem>>, vector<1x16x64xf32>,
    return
  }
  func.func @transform_0(%arg0: i32, %arg1: i32) -> (i32, i32, i32) {
    %c0_i32 = arith.constant 0 : i32
    %c0_i32_0 = arith.constant 0 : i32
    return %arg0, %arg1, %c0_i32 : i32, i32, i32
  }
  func.func @transform_1(%arg0: i32, %arg1: i32) -> (i32, i32, i32) {
    %c0_i32 = arith.constant 0 : i32
    %c0_i32_0 = arith.constant 0 : i32
    return %arg0, %c0_i32, %arg1 : i32, i32, i32
  }
  func.func @transform_2(%arg0: i32, %arg1: i32) -> (i32, i32) {
    %c0_i32 = arith.constant 0 : i32
    %c0_i32_0 = arith.constant 0 : i32
    %c0_i32_1 = arith.constant 0 : i32
    return %c0_i32, %c0_i32_0 : i32, i32
  }
  func.func @transform_3(%arg0: i32, %arg1: i32) -> (i32, i32) {
    %c0_i32 = arith.constant 0 : i32
    %c0_i32_0 = arith.constant 0 : i32
    %c0_i32_1 = arith.constant 0 : i32
    return %c0_i32, %c0_i32_0 : i32, i32
  }
  func.func @transform_4(%arg0: i32, %arg1: i32) -> (i32, i32, i32) {
    %c0_i32 = arith.constant 0 : i32
    %c0_i32_0 = arith.constant 0 : i32
    return %arg0, %c0_i32, %arg1 : i32, i32, i32
  }
}

module attributes {stable_mosaic.version = 11 : i64} {
  func.func @out_kernel(%arg0: i32, %arg1: i32, %arg2: memref<1x4x64xf32, #tpu.memory_space<vmem>>, %arg3: memref<1x4x64xf32, #tpu.memory_space<vmem>>, %arg4: memref<4x64xf32, #tpu.memory_space<vmem>>, %arg5: memref<4x64xf32, #tpu.memory_space<vmem>>, %arg6: memref<1x64xf32, #tpu.memory_space<vmem>>, %arg7: memref<1x64x32xf32, #tpu.memory_space<vmem>>) attributes {dimension_semantics = [#tpu.dimension_semantics<parallel>, #tpu.dimension_semantics<parallel>], iteration_bounds = array<i64: 2, 1>, scalar_prefetch = 0 : i64, scratch_operands = 0 : i64, tpu.core_type = #tpu.core_type<tc>, window_params = [{transform_indices = @transform_0, window_bounds = array<i64: 1, 4, 64>}, {transform_indices = @transform_1, window_bounds = array<i64: 1, 4, 64>}, {pipeline_mode = #tpu.pipeline_mode<synchronous>, transform_indices = @transform_2, window_bounds = array<i64: 4, 64>}, {pipeline_mode = #tpu.pipeline_mode<synchronous>, transform_indices = @transform_3, window_bounds = array<i64: 4, 64>}, {pipeline_mode = #tpu.pipeline_mode<synchronous>, transform_indices = @transform_4, window_bounds = array<i64: 1, 64>}, {transform_indices = @transform_5, window_bounds = array<i64: 1, 64, 32>}]} {
    %c0 = arith.constant 0 : index
    %c0_0 = arith.constant 0 : index
    %c0_1 = arith.constant 0 : index
    %0 = vector.load %arg2[%c0, %c0_0, %c0_1] : memref<1x4x64xf32, #tpu.memory_space<vmem>>, vector<1x4x64xf32>
    %1 = vector.shape_cast %0 : vector<1x4x64xf32> to vector<4x64xf32>
    %c0_2 = arith.constant 0 : index
    %c0_3 = arith.constant 0 : index
    %2 = vector.load %arg4[%c0_2, %c0_3] : memref<4x64xf32, #tpu.memory_space<vmem>>, vector<4x64xf32>
    %cst = arith.constant dense<0.000000e+00> : vector<64x64xf32>
    %3 = tpu.matmul %1, %2, %cst {dimension_numbers = #tpu.dot_dimension_numbers<[0], [0], [1], [1], [0, 1, 1, 1], [], []>} : vector<4x64xf32>, vector<4x64xf32>, vector<64x64xf32> -> vector<64x64xf32>
    %c0_4 = arith.constant 0 : index
    %c0_5 = arith.constant 0 : index
    %c0_6 = arith.constant 0 : index
    %4 = vector.load %arg3[%c0_4, %c0_5, %c0_6] : memref<1x4x64xf32, #tpu.memory_space<vmem>>, vector<1x4x64xf32>
    %5 = vector.shape_cast %4 : vector<1x4x64xf32> to vector<4x64xf32>
    %c0_7 = arith.constant 0 : index
    %c0_8 = arith.constant 0 : index
    %6 = vector.load %arg5[%c0_7, %c0_8] : memref<4x64xf32, #tpu.memory_space<vmem>>, vector<4x64xf32>
    %cst_9 = arith.constant dense<0.000000e+00> : vector<64x64xf32>
    %7 = tpu.matmul %5, %6, %cst_9 {dimension_numbers = #tpu.dot_dimension_numbers<[0], [0], [1], [1], [0, 1, 1, 1], [], []>} : vector<4x64xf32>, vector<4x64xf32>, vector<64x64xf32> -> vector<64x64xf32>
    %8 = arith.addf %3, %7 : vector<64x64xf32>
    %c0_10 = arith.constant 0 : index
    %c0_11 = arith.constant 0 : index
    %9 = vector.load %arg6[%c0_10, %c0_11] : memref<1x64xf32, #tpu.memory_space<vmem>>, vector<1x64xf32>
    %10 = vector.broadcast %9 : vector<1x64xf32> to vector<64x64xf32>
    %11 = arith.addf %8, %10 : vector<64x64xf32>
    %12 = vector.extract_strided_slice %11 {offsets = [0, 0], sizes = [64, 32], strides = [1, 1]} : vector<64x64xf32> to vector<64x32xf32>
    %cst_12 = arith.constant 5.000000e-01 : f32
    %13 = vector.broadcast %cst_12 : f32 to vector<64x32xf32>
    %14 = arith.mulf %13, %12 : vector<64x32xf32>
    %15 = math.tanh %14 : vector<64x32xf32>
    %cst_13 = arith.constant 1.000000e+00 : f32
    %16 = vector.broadcast %cst_13 : f32 to vector<64x32xf32>
    %17 = arith.addf %15, %16 : vector<64x32xf32>
    %cst_14 = arith.constant 5.000000e-01 : f32
    %18 = vector.broadcast %cst_14 : f32 to vector<64x32xf32>
    %19 = arith.mulf %18, %17 : vector<64x32xf32>
    %20 = vector.extract_strided_slice %11 {offsets = [0, 32], sizes = [64, 32], strides = [1, 1]} : vector<64x64xf32> to vector<64x32xf32>
    %21 = arith.mulf %19, %20 : vector<64x32xf32>
    %c0_15 = arith.constant 0 : index
    %c0_16 = arith.constant 0 : index
    %c0_17 = arith.constant 0 : index
    %22 = vector.load %arg7[%c0_15, %c0_16, %c0_17] : memref<1x64x32xf32, #tpu.memory_space<vmem>>, vector<1x64x32xf32>
    %23 = vector.shape_cast %22 : vector<1x64x32xf32> to vector<64x32xf32>
    %24 = vector.shape_cast %21 : vector<64x32xf32> to vector<1x64x32xf32>
    tpu.vector_store %arg7[%c0_15, %c0_16, %c0_17], %24 {strides = array<i32>} : memref<1x64x32xf32, #tpu.memory_space<vmem>>, vector<1x64x32xf32>,
    return
  }
  func.func @transform_0(%arg0: i32, %arg1: i32) -> (i32, i32, i32) {
    %c0_i32 = arith.constant 0 : i32
    %c0_i32_0 = arith.constant 0 : i32
    return %arg0, %c0_i32, %arg1 : i32, i32, i32
  }
  func.func @transform_1(%arg0: i32, %arg1: i32) -> (i32, i32, i32) {
    %c0_i32 = arith.constant 0 : i32
    %c0_i32_0 = arith.constant 0 : i32
    return %arg0, %c0_i32, %arg1 : i32, i32, i32
  }
  func.func @transform_2(%arg0: i32, %arg1: i32) -> (i32, i32) {
    %c0_i32 = arith.constant 0 : i32
    %c0_i32_0 = arith.constant 0 : i32
    %c0_i32_1 = arith.constant 0 : i32
    return %c0_i32, %c0_i32_0 : i32, i32
  }
  func.func @transform_3(%arg0: i32, %arg1: i32) -> (i32, i32) {
    %c0_i32 = arith.constant 0 : i32
    %c0_i32_0 = arith.constant 0 : i32
    %c0_i32_1 = arith.constant 0 : i32
    return %c0_i32, %c0_i32_0 : i32, i32
  }
  func.func @transform_4(%arg0: i32, %arg1: i32) -> (i32, i32) {
    %c0_i32 = arith.constant 0 : i32
    %c0_i32_0 = arith.constant 0 : i32
    %c0_i32_1 = arith.constant 0 : i32
    return %c0_i32, %c0_i32_0 : i32, i32
  }
  func.func @transform_5(%arg0: i32, %arg1: i32) -> (i32, i32, i32) {
    %c0_i32 = arith.constant 0 : i32
    %c0_i32_0 = arith.constant 0 : i32
    return %arg0, %arg1, %c0_i32 : i32, i32, i32
  }
}

</mosaic_0001>

<bundles_post_ra>
// kernel: triangular_update.3
= control target key start
LH: loop header
LB: loop body
LE: loop exit
PB: predicated region body
PF: predicated region fallthrough
CT: control target
= control target key end

     0   :  { %s941_s15 = smov 0   ;;  %s943_s16 = smov 0   ;;  %s1104_s0 = inlined_call_operand.vmem [shape: f32[2,64,32], index: 0, kind: input, shape index: {}]   ;;  %s1105_s1 = inlined_call_operand.vmem [shape: f32[2,1,64], index: 1, kind: input, shape index: {}]   ;;  %s1106_s2 = inlined_call_operand.vmem [shape: f32[32,32], index: 2, kind: input, shape index: {}]   ;;  %s1107_s3 = inlined_call_operand.vmem [shape: f32[32,1], index: 3, kind: input, shape index: {}]   ;;  %s1108_s4 = inlined_call_operand.vmem [shape: f32[2,16,64], index: 4, kind: output, shape index: {}]  }
   0x1   :  { %s945_s17 = smov 0  }
   0x2 LB: > { %s26_s18 = sadd.s32 1, %s909_s16  ;;  %p708_p0 = scmp.ge.s32.totalorder %s913_s17, 1  ;;  %s913_s17 = sphi %s945_s17, %s14_s17   ;;  %s909_s16 = sphi %s943_s16, %s1112_s16   ;;  %s905_s15 = sphi %s941_s15, %s1111_s15  }
   0x3   : > { %p28_p1 = scmp.ge.s32.totalorder %s26_s18, 2  ;;  %p196_p2 = scmp.lt.s32.totalorder %s913_s17, 3 }
   0x5   : > { %s1114_s18 = smov (%p28_p1, %s26_s18), 0  ;;  %p197_p3 = pnand %p708_p0, %p196_p2 }
   0x6   : > { %p236_p4 = scmp.lt.s32.totalorder (!%p197_p3), %s905_s15, 1  ;;  %vm267_vm0 = vcmask (!%p197_p3), 261120   ;;  %v374_v56 = vld [vmem:[%s1106_s2] sm:$0xff] (!%p197_p3)  ;;  %v493_v57 = vld [vmem:[%s1106_s2 + $0x10] sm:$0xff] (!%p197_p3)  ;;  %v377_v58 = vld [vmem:[%s1107_s3 + $0x8] sm:$0xff] (!%p197_p3)  ;;  %v915_v59 = vmov (!%p197_p3), 0  }
   0x7   : > { %200 = sbr.rel (%p197_p3) target bundleno = 602 (0x25a), region = 36  ;;  %774 = vmatprep.mubr.msk.f32.mxu0 (!%p197_p3), %vm267_vm0, %v374_v56  ;;  %793 = vmatprep.mubr.msk.f32.mxu1 (!%p197_p3), %vm267_vm0, %v493_v57  ;;  %v376_v60 = vld [vmem:[%s1107_s3] sm:$0xff] (!%p197_p3)  ;;  %v495_v61 = vld [vmem:[%s1107_s3 + $0x10] sm:$0xff] (!%p197_p3)  ;;  %v496_v62 = vld [vmem:[%s1107_s3 + $0x18] sm:$0xff] (!%p197_p3)  ;;  %vm606_vm2 = vcmask (!%p197_p3), 523264  }
   0x8   : > { %870 = vset.pattern.permute.xlu1 (!%p197_p3), %v915_v59  ;;  %869 = vset.pattern.permute.xlu0 (!%p197_p3), %v915_v59  ;;  %vm1037_vm1 = vmpackc.low (!%p197_p3), %vm267_vm0, %vm267_vm0 }
   0xe   : > { %s1116_s15 = smov (!%p236_p4, %s905_s15), 1 }
   0xf   : > { %s736_s19 = sshll.u32 %s1116_s15, 6  ;;  %s737_s20 = sshll.u32 %s1116_s15, 4 }
  0x10   : > { %s243_s22 = scalar_lea.vmem %s1104_s0, %s736_s19  ;;  %s250_s19 = scalar_lea.vmem %s1105_s1, %s1116_s15 }
  0x11   : > { %v259_v0 = vld [vmem:[%s243_s22] sm:$0xff]  ;;  %v261_v1 = vld [vmem:[%s243_s22 + $0x10] sm:$0xff]  ;;  %v260_v2 = vld [vmem:[%s243_s22 + $0x8] sm:$0xff]  ;;  %s258_s23 = scalar_lea.vmem %s1108_s4, %s737_s20 }
  0x12   : > { %v268_v3 = vsel %vm267_vm0, %v259_v0, 0.0  ;;  %v274_v4 = vsel %vm267_vm0, %v261_v1, 0.0  ;;  %v262_v5 = vld [vmem:[%s243_s22 + $0x18] sm:$0xff]  ;;  %v271_v6 = vsel %vm267_vm0, %v260_v2, 0.0  ;;  %v263_v8 = vld [vmem:[%s243_s22 + $0x20] sm:$0xff]  ;;  %v264_v9 = vld [vmem:[%s243_s22 + $0x28] sm:$0xff] }
  0x13   : > { %269 = vadd.xlane.f32.xlu0 %v268_v3  ;;  %275 = vadd.xlane.f32.xlu1 %v274_v4  ;;  %v277_v7 = vsel %vm267_vm0, %v262_v5, 0.0  ;;  %v280_v10 = vsel %vm267_vm0, %v263_v8, 0.0  ;;  %v283_v11 = vsel %vm267_vm0, %v264_v9, 0.0  ;;  %v265_v12 = vld [vmem:[%s243_s22 + $0x30] sm:$0xff]  ;;  %v266_v13 = vld [vmem:[%s243_s22 + $0x38] sm:$0xff] }
  0x14   : > { %v286_v14 = vsel %vm267_vm0, %v265_v12, 0.0  ;;  %v289_v15 = vsel %vm267_vm0, %v266_v13, 0.0 }
  0x17   : > { %272 = vadd.xlane.f32.xlu0 %v271_v6  ;;  %278 = vadd.xlane.f32.xlu1 %v277_v7 }
  0x1b   : > { %281 = vadd.xlane.f32.xlu0 %v280_v10  ;;  %284 = vadd.xlane.f32.xlu1 %v283_v11 }
  0x1f   : > { %287 = vadd.xlane.f32.xlu0 %v286_v14  ;;  %290 = vadd.xlane.f32.xlu1 %v289_v15 }
  0xa0   : > { %v270_v16 = vpop.xlane.xlu0 %269  ;;  %v276_v17 = vpop.xlane.xlu1 %275 }
  0xa1   : > { %v293_v18 = vmul.f32 0.03125, %v270_v16  ;;  %v295_v19 = vmul.f32 0.03125, %v276_v17 }
  0xa3   : > { %v973_v20 = vsub.f32 %v259_v0, %v293_v18  ;;  %v975_v21 = vsub.f32 %v261_v1, %v295_v19 }
  0xa4   : > { %v273_v22 = vpop.xlane.xlu0 %272  ;;  %v279_v23 = vpop.xlane.xlu1 %278 }
  0xa5   : > { %v294_v24 = vmul.f32 0.03125, %v273_v22  ;;  %v296_v25 = vmul.f32 0.03125, %v279_v23  ;;  %v309_v26 = vmul.f32 %v973_v20, %v973_v20  ;;  %v311_v27 = vmul.f32 %v975_v21, %v975_v21 }
  0xa7   : > { %v981_v28 = vsub.f32 %v260_v2, %v294_v24  ;;  %v983_v29 = vsub.f32 %v262_v5, %v296_v25  ;;  %v317_v30 = vsel %vm267_vm0, %v309_v26, 0.0  ;;  %v323_v33 = vsel %vm267_vm0, %v311_v27, 0.0 }
  0xa8   : > { %318 = vadd.xlane.f32.xlu0 %v317_v30  ;;  %v282_v31 = vpop.xlane.xlu0 %281  ;;  %v285_v32 = vpop.xlane.xlu1 %284 }
  0xa9   : > { %v297_v34 = vmul.f32 0.03125, %v282_v31  ;;  %v298_v35 = vmul.f32 0.03125, %v285_v32  ;;  %v310_v36 = vmul.f32 %v981_v28, %v981_v28  ;;  %v312_v37 = vmul.f32 %v983_v29, %v983_v29 }
  0xab   : > { %v991_v38 = vsub.f32 %v263_v8, %v297_v34  ;;  %v993_v39 = vsub.f32 %v264_v9, %v298_v35  ;;  %v320_v40 = vsel %vm267_vm0, %v310_v36, 0.0  ;;  %v326_v43 = vsel %vm267_vm0, %v312_v37, 0.0 }
  0xac   : > { %324 = vadd.xlane.f32.xlu0 %v323_v33  ;;  %321 = vadd.xlane.f32.xlu1 %v320_v40  ;;  %v288_v41 = vpop.xlane.xlu0 %287  ;;  %v291_v42 = vpop.xlane.xlu1 %290 }
  0xad   : > { %v299_v44 = vmul.f32 0.03125, %v288_v41  ;;  %v300_v45 = vmul.f32 0.03125, %v291_v42  ;;  %v313_v46 = vmul.f32 %v991_v38, %v991_v38  ;;  %v314_v47 = vmul.f32 %v993_v39, %v993_v39 }
  0xaf   : > { %v1001_v48 = vsub.f32 %v265_v12, %v299_v44  ;;  %v1003_v49 = vsub.f32 %v266_v13, %v300_v45  ;;  %v329_v50 = vsel %vm267_vm0, %v313_v46, 0.0  ;;  %v332_v51 = vsel %vm267_vm0, %v314_v47, 0.0  ;;  %v375_v44 = vld [vmem:[%s1106_s2 + $0x8] sm:$0xff]  ;;  %v494_v45 = vld [vmem:[%s1106_s2 + $0x18] sm:$0xff] }
  0xb0   : > { %327 = vadd.xlane.f32.xlu1 %v326_v43  ;;  %330 = vadd.xlane.f32.xlu0 %v329_v50 }
  0xb1   : > { %v315_v52 = vmul.f32 %v1001_v48, %v1001_v48  ;;  %v316_v53 = vmul.f32 %v1003_v49, %v1003_v49 }
  0xb3   : > { %v335_v54 = vsel %vm267_vm0, %v315_v52, 0.0  ;;  %v338_v55 = vsel %vm267_vm0, %v316_v53, 0.0 }
  0xb4   : > { %333 = vadd.xlane.f32.xlu1 %v332_v51  ;;  %336 = vadd.xlane.f32.xlu0 %v335_v54 }
  0xb8   : > { %339 = vadd.xlane.f32.xlu1 %v338_v55 }
  0xc9   : > { %385 = vperm.xlu1 %870, %v377_v58  }
  0xca   : > { %380 = vperm.xlu0 %869, %v376_v60  }
  0xcd   : > { %499 = vperm.xlu1 %870, %v495_v61  }
  0xd1   : > { %504 = vperm.xlu1 %870, %v496_v62  }
 0x135   : > { %v319_v63 = vpop.xlane.xlu0 %318 }
 0x136   : > { %v341_v0 = vmul.f32 0.03125, %v319_v63 }
 0x138   : > { %v349_v1 = vadd.f32 1e-05, %v341_v0 }
 0x139   : > { %v322_v2 = vpop.xlane.xlu1 %321  ;;  %v325_v3 = vpop.xlane.xlu0 %324 }
 0x13a   : > { %v342_v4 = vmul.f32 0.03125, %v322_v2  ;;  %v343_v5 = vmul.f32 0.03125, %v325_v3  ;;  %871 = vrsqrt.f32 %v349_v1 }
 0x13c   : > { %v350_v6 = vadd.f32 1e-05, %v342_v4  ;;  %v351_v7 = vadd.f32 1e-05, %v343_v5 }
 0x13d   : > { %v328_v8 = vpop.xlane.xlu1 %327  ;;  %v331_v9 = vpop.xlane.xlu0 %330 }
 0x13e   : > { %873 = vrsqrt.f32 %v350_v6  ;;  %v344_v10 = vmul.f32 0.03125, %v328_v8  ;;  %v345_v11 = vmul.f32 0.03125, %v331_v9 }
 0x13f   : > { %875 = vrsqrt.f32 %v351_v7 }
 0x140   : > { %v352_v12 = vadd.f32 1e-05, %v344_v10  ;;  %v353_v13 = vadd.f32 1e-05, %v345_v11 }
 0x141   : > { %v334_v14 = vpop.xlane.xlu1 %333  ;;  %v337_v16 = vpop.xlane.xlu0 %336 }
 0x142   : > { %877 = vrsqrt.f32 %v352_v12  ;;  %v346_v15 = vmul.f32 0.03125, %v334_v14  ;;  %v347_v22 = vmul.f32 0.03125, %v337_v16 }
 0x143   : > { %879 = vrsqrt.f32 %v353_v13 }
 0x144   : > { %v354_v17 = vadd.f32 1e-05, %v346_v15  ;;  %v872_v19 = vpop.eup %871  ;;  %v355_v31 = vadd.f32 1e-05, %v347_v22 }
 0x145   : > { %v340_v18 = vpop.xlane.xlu1 %339  ;;  %v365_v26 = vmul.f32 %v872_v19, %v973_v20 }
 0x146   : > { %881 = vrsqrt.f32 %v354_v17  ;;  %v348_v23 = vmul.f32 0.03125, %v340_v18 }
 0x148   : > { %v874_v24 = vpop.eup %873  ;;  %v356_v25 = vadd.f32 1e-05, %v348_v23 }
 0x149   : > { %v366_v27 = vmul.f32 %v874_v24, %v981_v28  ;;  %v876_v30 = vpop.eup %875  ;;  %v386_v46 = vpop.permute.xlu1 %385 }
 0x14a   : > { %883 = vrsqrt.f32 %v356_v25  ;;  %v367_v20 = vmul.f32 %v876_v30, %v975_v21  ;;  %v381_v47 = vpop.permute.xlu0 %380 }
 0x14b   : > { %v796_v33 = vpack.c.bf16 %v366_v27, %v365_v26  ;;  %885 = vrsqrt.f32 %v355_v31 }
 0x14c   : > { %v878_v34 = vpop.eup %877 }
 0x14d   : > { %798 = vmatprep.subr.msk.bf16.mxu0 %vm1037_vm1, %v796_v33  ;;  %822 = vmatprep.subr.msk.bf16.mxu1 %vm1037_vm1, %v796_v33  ;;  %v368_v28 = vmul.f32 %v878_v34, %v983_v29  ;;  %v880_v35 = vpop.eup %879  ;;  %v500_v59 = vpop.permute.xlu1 %499 }
 0x14e   : > { %801 = vmatpush3.bf16.xpose.msk.msra.mxu0 %vm1037_vm1, %v796_v33  ;;  %825 = vmatpush3.bf16.xpose.msk.msra.mxu1 %vm1037_vm1, %v796_v33  ;;  %v369_v29 = vmul.f32 %v880_v35, %v991_v38 }
 0x14f   : > { %v802_v36 = vpack.c.bf16 %v368_v28, %v367_v20 }
 0x150   : > { %v882_v37 = vpop.eup %881 }
 0x151   : > { %804 = vmatprep.subr.msk.bf16.mxu0 %vm1037_vm1, %v802_v36  ;;  %828 = vmatprep.subr.msk.bf16.mxu1 %vm1037_vm1, %v802_v36  ;;  %v370_v21 = vmul.f32 %v882_v37, %v993_v39  ;;  %v505_v61 = vpop.permute.xlu1 %504 }
 0x153   : > { %v808_v40 = vpack.c.bf16 %v370_v21, %v369_v29 }
 0x154   : > { %v884_v41 = vpop.eup %883 }
 0x155   : > { %v886_v42 = vpop.eup %885  ;;  %v372_v39 = vmul.f32 %v884_v41, %v1003_v49 }
 0x156   : > { %807 = vmatpush3.bf16.xpose.msk.msra.mxu0 %vm1037_vm1, %v802_v36  ;;  %831 = vmatpush3.bf16.xpose.msk.msra.mxu1 %vm1037_vm1, %v802_v36  ;;  %v371_v38 = vmul.f32 %v886_v42, %v1001_v48  ;;  %v733_v48 = vld [vmem:[%s250_s19] ss:$0 sm:$0xff] }
 0x157   : > { %810 = vmatprep.subr.msk.bf16.mxu0 %vm1037_vm1, %v808_v40  ;;  %834 = vmatprep.subr.msk.bf16.mxu1 %vm1037_vm1, %v808_v40 }
 0x158   : > { %v814_v43 = vpack.c.bf16 %v372_v39, %v371_v38 }
 0x15e   : > { %813 = vmatpush3.bf16.xpose.msk.msra.mxu0 %vm1037_vm1, %v808_v40  ;;  %837 = vmatpush3.bf16.xpose.msk.msra.mxu1 %vm1037_vm1, %v808_v40 }
 0x15f   : > { %816 = vmatprep.subr.msk.bf16.mxu0 %vm1037_vm1, %v814_v43  ;;  %840 = vmatprep.subr.msk.bf16.mxu1 %vm1037_vm1, %v814_v43 }
 0x166   : > { %819 = vmatpush3.bf16.xpose.msk.msra.mxu0 %vm1037_vm1, %v814_v43  ;;  %843 = vmatpush3.bf16.xpose.msk.msra.mxu1 %vm1037_vm1, %v814_v43 }
 0x16d   : > { %775 = vmatmul.mubr.msk.f32.vlgmr.msra.gmra.mrb[0].mxu0 %vm267_vm0, %v375_v44  ;;  %794 = vmatmul.mubr.msk.f32.vlgmr.msra.gmra.mrb[0].mxu1 %vm267_vm0, %v494_v45 }
 0x240   : > { %v776_v49 = vpop.f32.mrb[0].mxu0  ;;  %v795_v50 = vpop.f32.mrb[0].mxu1 }
 0x241   : > { %v490_v51 = vadd.f32 %v776_v49, %v386_v46  ;;  %v484_v52 = vpop.f32.mrb[1].mxu0  ;;  %v579_v53 = vpop.f32.mrb[1].mxu1  ;;  %v585_v1 = vadd.f32 %v795_v50, %v505_v61 }
 0x242   : > { %v485_v54 = vadd.f32 %v484_v52, %v381_v47  ;;  %v580_v3 = vadd.f32 %v579_v53, %v500_v59 }
 0x243   : > { %v595_v55 = vadd.f32 %v733_v48, %v490_v51 }
 0x244   : > { %v594_v56 = vadd.f32 %v733_v48, %v485_v54 }
 0x245   : > { %v597_v57 = vmul.f32 0.5, %v595_v55 }
 0x246   : > { %v596_v58 = vmul.f32 0.5, %v594_v56 }
 0x247   : > { %887 = vtanh.f32 %v597_v57 }
 0x248   : > { %889 = vtanh.f32 %v596_v58 }
 0x251   : > { %v888_v60 = vpop.eup %887 }
 0x252   : > { %v890_v62 = vpop.eup %889  ;;  %v601_v63 = vadd.f32 1.0, %v888_v60 }
 0x253   : > { %v600_v0 = vadd.f32 1.0, %v890_v62 }
 0x254   : > { %v603_v2 = vmul.f32 0.5, %v601_v63 }
 0x255   : > { %v602_v4 = vmul.f32 0.5, %v600_v0 }
 0x256   : > { %v605_v5 = vmul.f32 %v603_v2, %v585_v1 }
 0x257   : > { %v604_v6 = vmul.f32 %v602_v4, %v580_v3 }
 0x258   : > { %608 = vst.msk [vmem:[%s258_s23 + $0x8] sm:$0xff] %vm606_vm2, %v605_v5 }
 0x259   : > { %607 = vst.msk [vmem:[%s258_s23] sm:$0xff] %vm606_vm2, %v604_v6 }
 0x25a PF: > { %s14_s17 = sadd.s32 1, %s913_s17   ;;  %s1111_s15 = smov %s909_s16 }
 0x25b   : > { %p11_p5 = scmp.ge.s32.totalorder %s14_s17, 4   ;;  %s1112_s16 = smov %s1114_s18 }
 0x25d   :  { %13 = sbr.rel (!%p11_p5) target bundleno = 2 (0x2), region = 69 }

// kernel: triangular_update.5
= control target key start
LH: loop header
LB: loop body
LE: loop exit
PB: predicated region body
PF: predicated region fallthrough
CT: control target
= control target key end

     0   :  { %10 = vsyncpa [#allocation3], 0  ;;  %s1253_s0 = inlined_call_operand.vmem [shape: f32[2,4,64], index: 0, kind: input, shape index: {}]   ;;  %s1254_s1 = inlined_call_operand.vmem [shape: f32[2,4,64], index: 1, kind: input, shape index: {}]   ;;  %s1255_s2 = inlined_call_operand.vmem [shape: f32[4,64], index: 2, kind: input, shape index: {}]   ;;  %s1256_s3 = inlined_call_operand.vmem [shape: f32[4,64], index: 3, kind: input, shape index: {}]   ;;  %s1257_s4 = inlined_call_operand.vmem [shape: f32[1,64], index: 4, kind: input, shape index: {}]   ;;  %s1258_s5 = inlined_call_operand.hbm [shape: f32[2,64,32], index: 5, kind: output, shape index: {}]  }
   0x1   :  { %12 = vsyncpa [#allocation3 + $0x1], 0  ;;  %s1087_s18 = smov 0   ;;  %s1089_s19 = smov 0  }
   0x2   :  { %s1091_s20 = smov 0   ;;  %s1093_s21 = smov 0  }
   0x3   :  { %s1095_s22 = smov 0   ;;  %s1097_s23 = smov 0  }
   0x4 LB: > { %s811_s24 = sadd.s32 4294967295, %s1051_s23   ;;  %s812_s25 = sadd.s32 4294967294, %s1051_s23   ;;  %s1051_s23 = sphi %s1097_s23, %s18_s23   ;;  %s1047_s22 = sphi %s1095_s22, %s1265_s22   ;;  %s1043_s21 = sphi %s1093_s21, %s1264_s21   ;;  %s1039_s20 = sphi %s1091_s20, %s1263_s20   ;;  %s1035_s19 = sphi %s1089_s19, %s1262_s19   ;;  %s1031_s18 = sphi %s1087_s18, %s1261_s18  }
   0x5   : > { %s30_s26 = sadd.s32 1, %s1047_s22  ;;  %s158_s27 = sadd.s32 1, %s1039_s20 }
   0x6   : > { %p32_p0 = scmp.ge.s32.totalorder %s30_s26, 2  ;;  %p168_p1 = scmp.ne.s32.totalorder %s1039_s20, %s1035_s19 }
   0x7   : > { %p169_p2 = scmp.eq.s32.totalorder %s811_s24, 1  ;;  %p174_p3 = scmp.ne.s32.totalorder %s1035_s19, %s1031_s18 }
   0x8   : > { %s1267_s26 = smov (%p32_p0, %s30_s26), 0  ;;  %p175_p5 = scmp.eq.s32.totalorder %s812_s25, 1 }
   0x9   : > { %p1127_p4 = por %p169_p2, %p168_p1  ;;  %s153_s29 = ssub.s32 %s1047_s22, %s1267_s26 }
   0xa   : > { %p815_p6 = scmp.ge.s32.totalorder %s1051_s23, 1  ;;  %p156_p7 = scmp.eq.s32.totalorder %s153_s29, 0 }
   0xb   : > { %p1134_p8 = por %p175_p5, %p174_p3  ;;  %p222_p9 = scmp.lt.s32.totalorder %s1051_s23, 3 }
   0xc   : > { %s1140_s6 = scalar_select %p156_p7, %s1039_s20, %s158_s27  }
   0xd   : > { %p223_p10 = pnand %p815_p6, %p222_p9 }
   0xe   : > { %p259_p11 = scmp.lt.s32.totalorder (!%p223_p10), %s1043_s21, 1  ;;  %v277_v1 = vld [vmem:[%s1256_s3] sm:$0xf] (!%p223_p10)  ;;  %vm335_vm0 = vcmask (!%p223_p10), 1043456   ;;  %vm310_vm1 = vcmask (!%p223_p10), 31744   ;;  %s1053_s29 = smov (!%p223_p10), 96  }
   0xf   : > { %226 = sbr.rel (%p223_p10) target bundleno = 569 (0x239), region = 40  ;;  %862 = vmatprep.subr.msk.mxu1 (!%p223_p10), %vm335_vm0, %v277_v1  ;;  %v275_v3 = vld [vmem:[%s1255_s2] sm:$0xf] (!%p223_p10)  ;;  %vm695_vm2 = vcmask (!%p223_p10), 261120   ;;  %s843_s10 = sshll.u32 (!%p223_p10), %s1043_s21, 10 }
  0x10   : > { %863 = vmatpush3.msk.msra.mxu1 (!%p223_p10), %vm335_vm0, %v277_v1  ;;  %876 = vmatprep.subr.msk.mxu0 (!%p223_p10), %vm335_vm0, %v275_v3  ;;  %v837_v29 = vld [vmem:[%s1257_s4] ss:$0 sm:$0xff] (!%p223_p10)  ;;  %s1199_s14 = scalar_lea.hbm (!%p223_p10), %s1258_s5, %s843_s10 }
  0x11   : > { %877 = vmatpush3.msk.msra.mxu0 (!%p223_p10), %vm335_vm0, %v275_v3 }
  0x16   : > { %s260_s7 = scalar_select %p259_p11, %s1043_s21, 1 }
  0x18   : > { %s817_s8 = sshll.u32 %s260_s7, 2  ;;  %s256_s7 = sand.u32 1, %s1035_s19  }
  0x19   : > { %s272_s11 = scalar_lea.vmem %s1254_s1, %s817_s8  ;;  %s265_s16 = scalar_lea.vmem %s1253_s0, %s817_s8 }
  0x1a   : > { %v276_v0 = vld [vmem:[%s272_s11] sm:$0xf]  ;;  %s816_s8 = sshll.u32 %s256_s7, 6  ;;  %s1207_s21 = scalar_lea.sflag [#allocation3], %s256_s7 }
  0x1b   : > { %278 = vxpose.xlu0.b32.start.end [1/1] (short) (narrow) %v276_v0, 64  ;;  %v274_v2 = vld [vmem:[%s265_s16] sm:$0xf]  ;;  %s1178_s9 = scalar_lea.vmem [#allocation2], %s816_s8  ;;  %s1054_s16 = smov [#allocation2]  }
  0x1c   : > { %s720_s11 = sshll.u32 %s1178_s9, 4  ;;  %s977_s17 = sshll.u32 %s1054_s16, 4  ;;  %s1201_s11 = int_to_ptr.vmem [resolvable:$true] %s720_s11  ;;  %s978_s17 = int_to_ptr.vmem [resolvable:$false] %s977_s17 }
  0x1d   : > { %s973_s15 = scalar_lea.vmem %s1201_s11, 1024  ;;  %s979_s24 = scalar_lea.vmem %s978_s17, 2048 }
  0x1e   : > { %p974_p12 = scmp.ne.s32.totalorder %s1201_s11, %s973_s15  ;;  %p980_p1 = scmp.lt.s32.totalorder %s1201_s11, %s978_s17 }
  0x1f   : > { %p981_p2 = scmp.lt.s32.totalorder %s979_s24, %s973_s15 }
  0x20   : > { %p975_p13 = pnand %p974_p12, %p1127_p4 }
  0x21   : > { %p982_p3 = por %p981_p2, %p980_p1 }
  0x22   : > { %p976_p0 = pneg %p975_p13 }
  0x24   : > { %p983_p5 = pnand %p982_p3, %p976_p0 }
  0x38   : > { %444 = vxpose.xlu0.b32.start.end [1/1] (short) (narrow) %v274_v2, 64 }
  0x9b   : > { %v294_v4 = vpop.trf.xlu0 }
  0x9c   : > { %864 = vmatprep.mubr.msk.f32.mxu1 %vm310_vm1, %v294_v4 }
  0x9f   : > { %v295_v5 = vpop.trf.xlu0 }
  0xa0   : > { %865 = vmatmul.mubr.msk.f32.vlgmr.msra.gmra.mrb[0].mxu1 %vm310_vm1, %v295_v5 }
  0xa3   : > { %v296_v6 = vpop.trf.xlu0 }
  0xa4   : > { %867 = vmatprep.mubr.msk.f32.mxu1 %vm310_vm1, %v296_v6 }
  0xa7   : > { %v297_v7 = vpop.trf.xlu0 }
  0xa8   : > { %868 = vmatmul.mubr.msk.f32.gmra.mrb[2].mxu1 %vm310_vm1, %v297_v7 }
  0xab   : > { %v298_v8 = vpop.trf.xlu0 }
  0xac   : > { %870 = vmatprep.mubr.msk.f32.mxu1 %vm310_vm1, %v298_v8 }
  0xaf   : > { %v299_v9 = vpop.trf.xlu0 }
  0xb0   : > { %871 = vmatmul.mubr.msk.f32.gmra.mrb[4].mxu1 %vm310_vm1, %v299_v9 }
  0xb3   : > { %v300_v10 = vpop.trf.xlu0 }
  0xb4   : > { %873 = vmatprep.mubr.msk.f32.mxu1 %vm310_vm1, %v300_v10 }
  0xb7   : > { %v301_v11 = vpop.trf.xlu0 }
  0xb8   : > { %874 = vmatmul.mubr.msk.f32.gmra.mrb[6].mxu1 %vm310_vm1, %v301_v11 }
  0xbb   : > { %v460_v12 = vpop.trf.xlu0 }
  0xbc   : > { %878 = vmatprep.mubr.msk.f32.mxu0 %vm310_vm1, %v460_v12 }
  0xbf   : > { %v461_v13 = vpop.trf.xlu0 }
  0xc0   : > { %879 = vmatmul.mubr.msk.f32.vlgmr.msra.gmra.mrb[0].mxu0 %vm310_vm1, %v461_v13 }
  0xc3   : > { %v462_v14 = vpop.trf.xlu0 }
  0xc4   : > { %881 = vmatprep.mubr.msk.f32.mxu0 %vm310_vm1, %v462_v14 }
  0xc7   : > { %v463_v15 = vpop.trf.xlu0 }
  0xc8   : > { %882 = vmatmul.mubr.msk.f32.gmra.mrb[2].mxu0 %vm310_vm1, %v463_v15 }
  0xcb   : > { %v464_v16 = vpop.trf.xlu0 }
  0xcc   : > { %884 = vmatprep.mubr.msk.f32.mxu0 %vm310_vm1, %v464_v16 }
  0xcf   : > { %v465_v17 = vpop.trf.xlu0 }
  0xd0   : > { %885 = vmatmul.mubr.msk.f32.gmra.mrb[4].mxu0 %vm310_vm1, %v465_v17 }
  0xd3   : > { %v466_v18 = vpop.trf.xlu0 }
  0xd4   : > { %887 = vmatprep.mubr.msk.f32.mxu0 %vm310_vm1, %v466_v18 }
  0xd7   : > { %v467_v19 = vpop.trf.xlu0 }
  0xd8   : > { %888 = vmatmul.mubr.msk.f32.gmra.mrb[6].mxu0 %vm310_vm1, %v467_v19 }
 0x173   : > { %v866_v20 = vpop.f32.mrb[0].mxu1 }
 0x174   : > { %v405_v21 = vpop.f32.mrb[1].mxu1 }
 0x17b   : > { %v869_v22 = vpop.f32.mrb[2].mxu1 }
 0x17c   : > { %v415_v23 = vpop.f32.mrb[3].mxu1 }
 0x183   : > { %v872_v24 = vpop.f32.mrb[4].mxu1 }
 0x184   : > { %v425_v25 = vpop.f32.mrb[5].mxu1 }
 0x18b   : > { %v875_v26 = vpop.f32.mrb[6].mxu1 }
 0x18c   : > { %v435_v27 = vpop.f32.mrb[7].mxu1 }
 0x193   : > { %v880_v28 = vpop.f32.mrb[0].mxu0 }
 0x194   : > { %v575_v30 = vadd.f32 %v880_v28, %v866_v20  ;;  %v569_v31 = vpop.f32.mrb[1].mxu0 }
 0x195   : > { %v570_v32 = vadd.f32 %v569_v31, %v405_v21 }
 0x196   : > { %v616_v33 = vadd.f32 %v837_v29, %v575_v30 }
 0x197   : > { %v615_v34 = vadd.f32 %v837_v29, %v570_v32 }
 0x198   : > { %665 = vrot.lane.b32.xlu1 %v616_v33, %s1053_s29  ;;  %v624_v53 = vmul.f32 0.5, %v616_v33 }
 0x199   : > { %v623_v54 = vmul.f32 0.5, %v615_v34 }
 0x19a   : > { %957 = vtanh.f32 %v624_v53 }
 0x19b   : > { %v883_v35 = vpop.f32.mrb[2].mxu0  ;;  %959 = vtanh.f32 %v623_v54 }
 0x19c   : > { %v585_v36 = vadd.f32 %v883_v35, %v869_v22  ;;  %663 = vrot.lane.b32.xlu1 %v615_v34, %s1053_s29  ;;  %v579_v37 = vpop.f32.mrb[3].mxu0 }
 0x19d   : > { %v580_v38 = vadd.f32 %v579_v37, %v415_v23 }
 0x19e   : > { %v618_v39 = vadd.f32 %v837_v29, %v585_v36 }
 0x19f   : > { %v617_v40 = vadd.f32 %v837_v29, %v580_v38 }
 0x1a0   : > { %669 = vrot.lane.b32.xlu1 %v618_v39, %s1053_s29  ;;  %v626_v55 = vmul.f32 0.5, %v618_v39 }
 0x1a1   : > { %v625_v56 = vmul.f32 0.5, %v617_v40 }
 0x1a2   : > { %961 = vtanh.f32 %v626_v55 }
 0x1a3   : > { %v886_v41 = vpop.f32.mrb[4].mxu0  ;;  %963 = vtanh.f32 %v625_v56 }
 0x1a4   : > { %v595_v42 = vadd.f32 %v886_v41, %v872_v24  ;;  %667 = vrot.lane.b32.xlu1 %v617_v40, %s1053_s29  ;;  %v589_v43 = vpop.f32.mrb[5].mxu0  ;;  %v958_v57 = vpop.eup %957 }
 0x1a5   : > { %v590_v44 = vadd.f32 %v589_v43, %v425_v25  ;;  %v640_v59 = vadd.f32 1.0, %v958_v57  ;;  %v960_v60 = vpop.eup %959 }
 0x1a6   : > { %v620_v45 = vadd.f32 %v837_v29, %v595_v42  ;;  %v639_v63 = vadd.f32 1.0, %v960_v60 }
 0x1a7   : > { %v619_v46 = vadd.f32 %v837_v29, %v590_v44  ;;  %v648_v62 = vmul.f32 0.5, %v640_v59 }
 0x1a8   : > { %673 = vrot.lane.b32.xlu1 %v620_v45, %s1053_s29  ;;  %v628_v58 = vmul.f32 0.5, %v620_v45  ;;  %v647_v4 = vmul.f32 0.5, %v639_v63 }
 0x1a9   : > { %v627_v61 = vmul.f32 0.5, %v619_v46 }
 0x1aa   : > { %965 = vtanh.f32 %v628_v58 }
 0x1ab   : > { %v889_v47 = vpop.f32.mrb[6].mxu0  ;;  %967 = vtanh.f32 %v627_v61 }
 0x1ac   : > { %v605_v48 = vadd.f32 %v889_v47, %v875_v26  ;;  %671 = vrot.lane.b32.xlu1 %v619_v46, %s1053_s29  ;;  %v599_v49 = vpop.f32.mrb[7].mxu0  ;;  %v962_v0 = vpop.eup %961 }
 0x1ad   : > { %v600_v50 = vadd.f32 %v599_v49, %v435_v27  ;;  %v642_v5 = vadd.f32 1.0, %v962_v0  ;;  %v964_v6 = vpop.eup %963 }
 0x1ae   : > { %v622_v52 = vadd.f32 %v837_v29, %v605_v48  ;;  %v641_v11 = vadd.f32 1.0, %v964_v6 }
 0x1af   : > { %v621_v51 = vadd.f32 %v837_v29, %v600_v50  ;;  %v650_v10 = vmul.f32 0.5, %v642_v5 }
 0x1b0   : > { %v630_v9 = vmul.f32 0.5, %v622_v52  ;;  %v649_v15 = vmul.f32 0.5, %v641_v11 }
 0x1b1   : > { %675 = vrot.lane.b32.xlu1 %v621_v51, %s1053_s29  ;;  %v629_v3 = vmul.f32 0.5, %v621_v51 }
 0x1b3   : > { %969 = vtanh.f32 %v629_v3 }
 0x1b4   : > { %v966_v12 = vpop.eup %965  ;;  %971 = vtanh.f32 %v630_v9 }
 0x1b5   : > { %677 = vrot.lane.b32.xlu1 %v622_v52, %s1053_s29  ;;  %v644_v16 = vadd.f32 1.0, %v966_v12  ;;  %v968_v17 = vpop.eup %967 }
 0x1b6   : > { %v643_v21 = vadd.f32 1.0, %v968_v17 }
 0x1b7   : > { %v652_v20 = vmul.f32 0.5, %v644_v16 }
 0x1b8   : > { %v651_v25 = vmul.f32 0.5, %v643_v21 }
 0x1bd   : > { %v970_v23 = vpop.eup %969 }
 0x1be   : > { %v645_v27 = vadd.f32 1.0, %v970_v23  ;;  %v972_v28 = vpop.eup %971 }
 0x1bf   : > { %v646_v31 = vadd.f32 1.0, %v972_v28 }
 0x1c0   : > { %v653_v30 = vmul.f32 0.5, %v645_v27 }
 0x1c1   : > { %v654_v34 = vmul.f32 0.5, %v646_v31 }
 0x20a   : > { %v666_v1 = vpop.permute.xlu1 %665 }
 0x20b   : > { %v688_v2 = vmul.f32 %v666_v1, %v648_v62 }
 0x20d   : > { %697 = vst.msk [vmem:[%s1178_s9 + $0x8] sm:$0xff] %vm695_vm2, %v688_v2 }
 0x20e   : > { %v664_v7 = vpop.permute.xlu1 %663 }
 0x20f   : > { %v687_v8 = vmul.f32 %v664_v7, %v647_v4 }
 0x211   : > { %696 = vst.msk [vmem:[%s1178_s9] sm:$0xff] %vm695_vm2, %v687_v8 }
 0x212   : > { %v670_v13 = vpop.permute.xlu1 %669 }
 0x213   : > { %v690_v14 = vmul.f32 %v670_v13, %v650_v10 }
 0x215   : > { %699 = vst.msk [vmem:[%s1178_s9 + $0x18] sm:$0xff] %vm695_vm2, %v690_v14 }
 0x216   : > { %v668_v18 = vpop.permute.xlu1 %667 }
 0x217   : > { %v689_v19 = vmul.f32 %v668_v18, %v649_v15 }
 0x219   : > { %698 = vst.msk [vmem:[%s1178_s9 + $0x10] sm:$0xff] %vm695_vm2, %v689_v19 }
 0x21a   : > { %v674_v22 = vpop.permute.xlu1 %673 }
 0x21b   : > { %v692_v24 = vmul.f32 %v674_v22, %v652_v20 }
 0x21d   : > { %701 = vst.msk [vmem:[%s1178_s9 + $0x28] sm:$0xff] %vm695_vm2, %v692_v24 }
 0x21e   : > { %v672_v26 = vpop.permute.xlu1 %671 }
 0x21f   : > { %v691_v29 = vmul.f32 %v672_v26, %v651_v25 }
 0x221   : > { %700 = vst.msk [vmem:[%s1178_s9 + $0x20] sm:$0xff] %vm695_vm2, %v691_v29 }
 0x223   : > { %v676_v32 = vpop.permute.xlu1 %675 }
 0x224   : > { %v693_v33 = vmul.f32 %v676_v32, %v653_v30 }
 0x226   : > { %702 = vst.msk [vmem:[%s1178_s9 + $0x30] sm:$0xff] %vm695_vm2, %v693_v33 }
 0x227   : > { %v678_v35 = vpop.permute.xlu1 %677 }
 0x228   : > { %v694_v36 = vmul.f32 %v678_v35, %v654_v34 }
 0x22a   : > { %703 = vst.msk [vmem:[%s1178_s9 + $0x38] sm:$0xff] %vm695_vm2, %v694_v36 }
 0x22b   : > { %986 = shalt.err (!%p983_p5)
}
 0x22c   : > { %s987_s25 = scalar_lea.hbm %s1199_s14, 1024  ;;  %s991_s7 = scalar_lea.hbm %s1258_s5, 2048 }
 0x22d   : > { %p988_p6 = scmp.ne.s32.totalorder %s1199_s14, %s987_s25  ;;  %p992_p10 = scmp.lt.u32.totalorder %s1199_s14, %s1258_s5 }
 0x22e   : > { %p993_p11 = scmp.lt.u32.totalorder %s991_s7, %s987_s25  ;;  %p995_p13 = scmp.lt.u32.totalorder %s987_s25, %s1199_s14 }
 0x22f   : > { %p989_p7 = pnand %p988_p6, %p1127_p4 }
 0x230   : > { %p994_p12 = por %p993_p11, %p992_p10 }
 0x231   : > { %p990_p9 = pneg %p989_p7 }
 0x232   : > { %p996_p0 = por %p995_p13, %p994_p12 }
 0x234   : > { %p997_p1 = pnand %p996_p0, %p990_p9 }
 0x236   : > { %1000 = shalt.err (!%p997_p1)
}
 0x237   : > { %s1055_s10 = smov 128   ;;  %s1056_s12 = smov 8  }
 0x238   : > { %898 = dma.vmem_to_hbm [thread:$0]  (%p1127_p4), %s1201_s11, 1024, %s1199_s14, %s1207_s21, %s1055_s10, %s1055_s10, %s1056_s12  }
 0x239 PF: > { %p904_p2 = scmp.ge.s32.totalorder %s1051_s23, 2  ;;  %s735_s13 = sand.u32 1, %s1031_s18  }
 0x23a   : > { %s736_s15 = scalar_lea.sflag [#allocation3], %s735_s13 }
 0x23b   : > { %p901_p3 = pnand %p904_p2, %p1134_p8 }
 0x23d   : > { %1026 = dma.done.wait (!%p901_p3), %s736_s15, 1024  }
 0x23e   : > { %1028 = vsyncadd (!%p901_p3), %s736_s15, 4294966272  ;;  %s18_s23 = sadd.s32 1, %s1051_s23   ;;  %s1261_s18 = smov %s1035_s19 }
 0x23f   : > { %p15_p5 = scmp.ge.s32.totalorder %s18_s23, 4   ;;  %s1262_s19 = smov %s1039_s20 }
 0x240   : > { %s1263_s20 = smov %s1140_s6  ;;  %s1264_s21 = smov %s1047_s22 }
 0x241   : > { %s1265_s22 = smov %s1267_s26  ;;  %17 = sbr.rel (!%p15_p5) target bundleno = 4 (0x4), region = 78 }
 0x248   :  { %741 = vsyncpa [#allocation3], 1 }
 0x249   :  { %743 = vsyncpa [#allocation3 + $0x1], 1 }

// kernel: triangular_update.4
= control target key start
LH: loop header
LB: loop body
LE: loop exit
PB: predicated region body
PF: predicated region fallthrough
CT: control target
= control target key end

     0   :  { %s1612_s18 = smov 0   ;;  %s1614_s19 = smov 0   ;;  %s1705_s0 = inlined_call_operand.vmem [shape: f32[2,16,8,8], index: 0, kind: input, shape index: {}, may-alias: {0,1,2,3}]   ;;  %s1706_s1 = inlined_call_operand.vmem [shape: f32[2,16,8,8], index: 1, kind: input, shape index: {}, may-alias: {0,1,2,3}]   ;;  %s1707_s2 = inlined_call_operand.vmem [shape: f32[2,16,8,8], index: 2, kind: input, shape index: {}, may-alias: {0,1,2,3}]   ;;  %s1708_s3 = inlined_call_operand.vmem [shape: f32[2,16,8,8], index: 3, kind: input, shape index: {}, may-alias: {0,1,2,3}]   ;;  %s1709_s4 = inlined_call_operand.vmem [shape: f32[2,4,8,8], index: 4, kind: output, shape index: {0}]   ;;  %s1710_s5 = inlined_call_operand.vmem [shape: f32[2,4,8,8], index: 5, kind: output, shape index: {1}]  }
   0x1   :  { %s1616_s20 = smov 0  }
   0x2 LB: > { %s35_s21 = sadd.s32 1, %s1574_s19  ;;  %p1435_p0 = scmp.ge.s32.totalorder %s1578_s20, 1  ;;  %s1578_s20 = sphi %s1616_s20, %s16_s20   ;;  %s1574_s19 = sphi %s1614_s19, %s1712_s19   ;;  %s1570_s18 = sphi %s1612_s18, %s1711_s18  }
   0x3   : > { %p37_p1 = scmp.ge.s32.totalorder %s35_s21, 2  ;;  %p297_p2 = scmp.lt.s32.totalorder %s1578_s20, 3 }
   0x5   : > { %s1714_s21 = smov (%p37_p1, %s35_s21), 0  ;;  %p298_p3 = pnand %p1435_p0, %p297_p2 }
   0x6   : > { %p385_p4 = scmp.lt.s32.totalorder (!%p298_p3), %s1570_s18, 1  ;;  %v1580_v0 = vmov (!%p298_p3), 0.0   ;;  %vm1581_vm0 = vmmov (!%p298_p3), 0   ;;  %vm470_vm1 = vcmask (!%p298_p3), 64512  }
   0x7   : > { %301 = sbr.rel (%p298_p3) target bundleno = 369 (0x171), region = 36  ;;  %1490 = vmatprep.subr.mxu0 (!%p298_p3), %v1580_v0  ;;  %1492 = vmatprep.mubr.msk.f32.mxu0 (!%p298_p3), %vm1581_vm0, %v1580_v0 }
   0x8   : > { %1495 = vmatprep.subr.mxu1 (!%p298_p3), %v1580_v0  ;;  %1497 = vmatprep.mubr.msk.f32.mxu1 (!%p298_p3), %vm1581_vm0, %v1580_v0 }
   0xe   : > { %s1716_s18 = smov (!%p385_p4, %s1570_s18), 1 }
   0xf   : > { %s1462_s22 = sshll.u32 %s1716_s18, 7  ;;  %s1469_s13 = sshll.u32 %s1716_s18, 5 }
  0x10   : > { %s1468_s23 = sadd.s32 96, %s1462_s22  ;;  %s392_s26 = scalar_lea.vmem %s1705_s0, %s1462_s22 }
  0x11   : > { %s433_s29 = scalar_lea.vmem %s1708_s3, %s1468_s23  ;;  %v466_v1 = vld [vmem:[%s392_s26] sm:$0xff]  ;;  %s1466_s30 = sadd.s32 64, %s1462_s22  ;;  %v467_v2 = vld [vmem:[%s392_s26 + $0x8] sm:$0xff]  ;;  %v468_v6 = vld [vmem:[%s392_s26 + $0x10] sm:$0xff] }
  0x12   : > { %v779_v3 = vld [vmem:[%s433_s29] sm:$0xff]  ;;  %v781_v4 = vld [vmem:[%s433_s29 + $0x10] sm:$0xff]  ;;  %1491 = vmatpush3.xpose.msk.msra.mxu0 %vm470_vm1, %v466_v1  ;;  %s418_s8 = scalar_lea.vmem %s1707_s2, %s1466_s30  ;;  %1496 = vmatpush3.xpose.msk.msra.mxu1 %vm470_vm1, %v467_v2  ;;  %s1464_s9 = sadd.s32 32, %s1462_s22  ;;  %v780_v8 = vld [vmem:[%s433_s29 + $0x8] sm:$0xff] }
  0x13   : > { %787 = vxpose.xlu0.b32.start.end [1/1] (short) (narrow) %v779_v3, 8  ;;  %997 = vxpose.xlu1.b32.start.end [1/1] (short) (narrow) %v781_v4, 8  ;;  %v462_v5 = vld [vmem:[%s418_s8] sm:$0xff]  ;;  %v463_v7 = vld [vmem:[%s418_s8 + $0x8] sm:$0xff]  ;;  %v782_v9 = vld [vmem:[%s433_s29 + $0x18] sm:$0xff]  ;;  %s403_s12 = scalar_lea.vmem %s1706_s1, %s1464_s9  ;;  %s447_s16 = scalar_lea.vmem %s1709_s4, %s1469_s13 }
  0x14   : > { %1500 = vmatprep.subr.mxu0 %v1580_v0  ;;  %1505 = vmatprep.subr.mxu1 %v1580_v0  ;;  %v469_v10 = vld [vmem:[%s392_s26 + $0x18] sm:$0xff]  ;;  %v464_v11 = vld [vmem:[%s418_s8 + $0x10] sm:$0xff]  ;;  %v783_v12 = vld [vmem:[%s403_s12] sm:$0xff]  ;;  %s460_s22 = scalar_lea.vmem %s1710_s5, %s1469_s13 }
  0x15   : > { %1493 = vmatmul.mubr.msk.f32.vlgmr.msra.gmra.mrb[0].mxu0 %vm470_vm1, %v462_v5  ;;  %1498 = vmatmul.mubr.msk.f32.vlgmr.msra.gmra.mrb[0].mxu1 %vm470_vm1, %v463_v7  ;;  %v465_v13 = vld [vmem:[%s418_s8 + $0x18] sm:$0xff]  ;;  %v784_v14 = vld [vmem:[%s403_s12 + $0x8] sm:$0xff]  ;;  %v785_v15 = vld [vmem:[%s403_s12 + $0x10] sm:$0xff] }
  0x16   : > { %1501 = vmatpush3.xpose.msk.msra.mxu0 %vm470_vm1, %v468_v6  ;;  %1502 = vmatprep.mubr.msk.f32.mxu0 %vm1581_vm0, %v1580_v0  ;;  %v786_v18 = vld [vmem:[%s403_s12 + $0x18] sm:$0xff] }
  0x17   : > { %892 = vxpose.xlu0.b32.start.end [1/1] (short) (narrow) %v780_v8, 8  ;;  %1102 = vxpose.xlu1.b32.start.end [1/1] (short) (narrow) %v782_v9, 8 }
  0x18   : > { %1506 = vmatpush3.xpose.msk.msra.mxu1 %vm470_vm1, %v469_v10  ;;  %1507 = vmatprep.mubr.msk.f32.mxu1 %vm1581_vm0, %v1580_v0 }
  0x19   : > { %1503 = vmatmul.mubr.msk.f32.vlgmr.msra.gmra.mrb[2].mxu0 %vm470_vm1, %v464_v11  ;;  %1510 = vmatprep.subr.mxu0 %v1580_v0 }
  0x1a   : > { %1511 = vmatpush3.msra.mxu0 %v783_v12  ;;  %1512 = vmatprep.mubr.msk.f32.mxu0 %vm1581_vm0, %v1580_v0 }
  0x1b   : > { %1508 = vmatmul.mubr.msk.f32.vlgmr.msra.gmra.mrb[2].mxu1 %vm470_vm1, %v465_v13  ;;  %1515 = vmatprep.subr.mxu1 %v1580_v0 }
  0x1c   : > { %1516 = vmatpush3.msra.mxu1 %v784_v14  ;;  %1520 = vmatprep.subr.mxu0 %v1580_v0 }
  0x1d   : > { %1517 = vmatprep.mubr.msk.f32.mxu1 %vm1581_vm0, %v1580_v0  ;;  %1525 = vmatprep.subr.mxu1 %v1580_v0 }
  0x93   : > { %v803_v16 = vpop.trf.xlu0  ;;  %v1013_v17 = vpop.trf.xlu1 }
  0x94   : > { %1513 = vmatmul.mubr.msk.f32.vlgmr.msra.gmra.mrb[4].mxu0 %vm470_vm1, %v803_v16 }
  0x95   : > { %1521 = vmatpush3.msra.mxu0 %v785_v15  ;;  %1522 = vmatprep.mubr.msk.f32.mxu0 %vm1581_vm0, %v1580_v0 }
  0x97   : > { %v908_v19 = vpop.trf.xlu0  ;;  %v1118_v20 = vpop.trf.xlu1 }
  0x98   : > { %1518 = vmatmul.mubr.msk.f32.vlgmr.msra.gmra.mrb[4].mxu1 %vm470_vm1, %v908_v19  ;;  %1523 = vmatmul.mubr.msk.f32.vlgmr.msra.gmra.mrb[6].mxu0 %vm470_vm1, %v1013_v17 }
  0x99   : > { %1526 = vmatpush3.msra.mxu1 %v786_v18  ;;  %1527 = vmatprep.mubr.msk.f32.mxu1 %vm1581_vm0, %v1580_v0 }
  0x9c   : > { %1528 = vmatmul.mubr.msk.f32.vlgmr.msra.gmra.mrb[6].mxu1 %vm470_vm1, %v1118_v20 }
  0xe8   : > { %v543_v21 = vpop.f32.mrb[0].mxu0  ;;  %v619_v22 = vpop.f32.mrb[0].mxu1 }
  0xe9   : > { %775 = vst.msk [vmem:[%s447_s16] sm:$0xff] %vm470_vm1, %v543_v21  ;;  %776 = vst.msk [vmem:[%s447_s16 + $0x8] sm:$0xff] %vm470_vm1, %v619_v22  ;;  %v1494_v23 = vpop.f32.mrb[1].mxu0  ;;  %v1499_v24 = vpop.f32.mrb[1].mxu1 }
  0xec   : > { %v695_v25 = vpop.f32.mrb[2].mxu0 }
  0xed   : > { %777 = vst.msk [vmem:[%s447_s16 + $0x10] sm:$0xff] %vm470_vm1, %v695_v25  ;;  %v1504_v26 = vpop.f32.mrb[3].mxu0 }
  0xee   : > { %v771_v27 = vpop.f32.mrb[2].mxu1 }
  0xef   : > { %778 = vst.msk [vmem:[%s447_s16 + $0x18] sm:$0xff] %vm470_vm1, %v771_v27  ;;  %v1509_v28 = vpop.f32.mrb[3].mxu1 }
 0x167   : > { %v888_v29 = vpop.f32.mrb[4].mxu0 }
 0x168   : > { %1207 = vst.msk [vmem:[%s460_s22] sm:$0xff] %vm470_vm1, %v888_v29  ;;  %v1514_v30 = vpop.f32.mrb[5].mxu0 }
 0x16b   : > { %v993_v31 = vpop.f32.mrb[4].mxu1  ;;  %v1098_v32 = vpop.f32.mrb[6].mxu0 }
 0x16c   : > { %1208 = vst.msk [vmem:[%s460_s22 + $0x8] sm:$0xff] %vm470_vm1, %v993_v31  ;;  %1209 = vst.msk [vmem:[%s460_s22 + $0x10] sm:$0xff] %vm470_vm1, %v1098_v32  ;;  %v1519_v33 = vpop.f32.mrb[5].mxu1  ;;  %v1524_v34 = vpop.f32.mrb[7].mxu0 }
 0x16f   : > { %v1203_v35 = vpop.f32.mrb[6].mxu1 }
 0x170   : > { %1210 = vst.msk [vmem:[%s460_s22 + $0x18] sm:$0xff] %vm470_vm1, %v1203_v35  ;;  %v1529_v36 = vpop.f32.mrb[7].mxu1 }
 0x171 PF: > { %s16_s20 = sadd.s32 1, %s1578_s20   ;;  %s1711_s18 = smov %s1574_s19 }
 0x172   : > { %p13_p5 = scmp.ge.s32.totalorder %s16_s20, 4   ;;  %s1712_s19 = smov %s1714_s21 }
 0x174   :  { %15 = sbr.rel (!%p13_p5) target bundleno = 2 (0x2), region = 87 }

</bundles_post_ra>
